<compile_context>
chip_gen: v6e
topology: v6e:2x2x1
jax: 0.10.0
libtpu: 0.0.40
codegen_flags: <defaults>
</compile_context>

<pallas_src>
import functools

import jax
import jax.numpy as jnp
from jax.experimental import pallas as pl
from jax.experimental.pallas import tpu as pltpu

_BIG = 1e30  # sentinel so padded rows give exp(-~1e30) == 0 exactly


def _round_up(x, m):
    return (x + m - 1) // m * m


def proj_norm_kernel(x_ref, w_ref, b_ref, yn_ref, s_ref, *, m_valid, tile_m, rbf_t):
    """Projection (1x1 conv == per-pixel linear) + row-wise L2 normalization.

    Outputs:
      yn_ref: sqrt(2*rbf_t) * normalized rows, cast to bf16 (Gram operand).
      s_ref : -rbf_t * ||normalized row||^2 (f32); -1e30 sentinel for padding.
    """
    y = jnp.dot(x_ref[...], w_ref[...],
                preferred_element_type=jnp.float32) + b_ref[...]   # (TILE, P_pad)

    # F.normalize(dim=1, p=2, eps=1e-12): y * rsqrt(max(sum(y^2), 1e-24))
    sumsq = jnp.sum(y * y, axis=-1, keepdims=True)
    inv = jax.lax.rsqrt(jnp.maximum(sumsq, 1e-24))
    yn = y * inv

    # Pre-scale by sqrt(2*rbf_t) so the Gram dot directly yields 2*rbf_t*<i,j>.
    yn_ref[...] = (yn * (2.0 * rbf_t) ** 0.5).astype(yn_ref.dtype)

    # ||yn||^2 == sumsq * inv^2 (1 for normal rows, <1 only for degenerate rows)
    nsq = sumsq * (inv * inv)
    row = pl.program_id(0) * tile_m + jax.lax.broadcasted_iota(
        jnp.int32, (tile_m, 1), 0)
    s_ref[...] = jnp.where(row < m_valid, -rbf_t * nsq, -_BIG)


def gram_sum_kernel(yn_i_ref, yn_j_ref, s_i_ref, s_j_ref, rowsum_ref):
    """One (TILE, TILE) tile of exp(-rbf_t * ||yn_i - yn_j||^2) = exp(s_i + s_j + g),
    lane-reduced and accumulated into the resident (TILE, 1) output block."""
    j = pl.program_id(1)

    @pl.when(j == 0)
    def _init():
        rowsum_ref[...] = jnp.zeros_like(rowsum_ref)

    # bf16 Gram tile on the MXU (f32 accumulation); contracting dim 1 of both
    # operands avoids materializing a transposed copy of yn in HBM.
    g = jax.lax.dot_general(
        yn_i_ref[...], yn_j_ref[...],
        dimension_numbers=(((1,), (1,)), ((), ())),
        preferred_element_type=jnp.float32)                       # (TILE, TILE)
    e = jnp.exp(s_i_ref[...] + s_j_ref[...] + g)
    rowsum_ref[...] += jnp.sum(e, axis=1, keepdims=True)


def uniformity_loss(features, proj_w, proj_b, *, kernel_size, stride,
                    rbf_t=2.0, tile=512):
    """features: (bs, C, H, W) float32 (NCHW, like PyTorch)."""
    assert tile % 128 == 0, "tile must be a multiple of 128"

    # avg_pool2d (plain-JAX glue)
    pooled = jax.lax.reduce_window(
        features, 0.0, jax.lax.add,
        window_dimensions=(1, 1, kernel_size, kernel_size),
        window_strides=(1, 1, stride, stride),
        padding="VALID",
    ) / float(kernel_size * kernel_size)

    bs, c, h, w = pooled.shape
    m = bs * h * w
    if m < 2:
        raise ValueError("UniformityLoss needs at least 2 points (bs*h*w >= 2).")
    p = proj_w.shape[1]

    # permute(0, 2, 3, 1).reshape(bs*h*w, C)   (glue)
    x = jnp.transpose(pooled, (0, 2, 3, 1)).reshape(m, c).astype(jnp.float32)

    # Zero-pad feature dims to the 128-lane width and rows to the tile size.
    # (Zero feature columns change neither the row norm nor the Gram matrix.)
    c_pad = _round_up(c, 128)
    p_pad = _round_up(p, 128)
    m_pad = _round_up(m, tile)
    t = m_pad // tile
    # NOTE: on v7x keep t >= 2 for large M (two TensorCores shard the
    # "parallel" row-tile axis); tile=512 keeps VMEM well under all limits.

    xp = jnp.zeros((m_pad, c_pad), jnp.float32).at[:m, :c].set(x)
    wp = jnp.zeros((c_pad, p_pad), jnp.float32).at[:c, :p].set(
        proj_w.astype(jnp.float32))
    bp = jnp.zeros((1, p_pad), jnp.float32).at[0, :p].set(
        proj_b.astype(jnp.float32))

    # --- Kernel 1: projection + normalization, once per row tile.
    yn, s = pl.pallas_call(
        functools.partial(proj_norm_kernel, m_valid=m, tile_m=tile,
                          rbf_t=float(rbf_t)),
        out_shape=(jax.ShapeDtypeStruct((m_pad, p_pad), jnp.bfloat16),
                   jax.ShapeDtypeStruct((m_pad, 1), jnp.float32)),
        grid=(t,),
        in_specs=[pl.BlockSpec((tile, c_pad), lambda i: (i, 0)),
                  pl.BlockSpec((c_pad, p_pad), lambda i: (0, 0)),
                  pl.BlockSpec((1, p_pad), lambda i: (0, 0))],
        out_specs=(pl.BlockSpec((tile, p_pad), lambda i: (i, 0)),
                   pl.BlockSpec((tile, 1), lambda i: (i, 0))),
        compiler_params=pltpu.CompilerParams(
            dimension_semantics=("parallel",)),
    )(xp, wp, bp)

    # Row-vector view of s for the column side (m_pad*4 bytes of glue).
    s_row = s.reshape(1, m_pad)

    # --- Kernel 2: tiled symmetric Gram + exp; yn streamed for both operands,
    # (tile, 1) partial sums accumulated in the resident output block.
    row_sums = pl.pallas_call(
        gram_sum_kernel,
        out_shape=jax.ShapeDtypeStruct((m_pad, 1), jnp.float32),
        grid=(t, t),
        in_specs=[pl.BlockSpec((tile, p_pad), lambda i, j: (i, 0)),
                  pl.BlockSpec((tile, p_pad), lambda i, j: (j, 0)),
                  pl.BlockSpec((tile, 1), lambda i, j: (i, 0)),
                  pl.BlockSpec((1, tile), lambda i, j: (0, j))],
        out_specs=pl.BlockSpec((tile, 1), lambda i, j: (i, 0)),
        compiler_params=pltpu.CompilerParams(
            dimension_semantics=("parallel", "arbitrary")),
    )(yn, yn, s, s_row)

    # Symmetric-sum identity: full sum = 2 * sum_{i<j} e_ij + sum_i e_ii, and
    # e_ii == 1 for every valid row (d2[i,i] == 0); padded rows contribute 0.
    total = jnp.sum(row_sums)
    pair_sum = 0.5 * (total - m)
    n_pairs = m * (m - 1) // 2
    return jnp.log(pair_sum / n_pairs)


def _reference_loss(features, proj_w, proj_b, *, kernel_size, stride, rbf_t):
    """Pure-JAX f32 reference mirroring the PyTorch module (sanity check only)."""
    pooled = jax.lax.reduce_window(
        features, 0.0, jax.lax.add,
        window_dimensions=(1, 1, kernel_size, kernel_size),
        window_strides=(1, 1, stride, stride),
        padding="VALID",
    ) / float(kernel_size * kernel_size)
    bs, c, h, w = pooled.shape
    x = jnp.transpose(pooled, (0, 2, 3, 1)).reshape(bs * h * w, c)
    y = x @ proj_w + proj_b
    yn = y / jnp.maximum(jnp.sqrt(jnp.sum(y * y, axis=1, keepdims=True)), 1e-12)
    d2 = jnp.sum((yn[:, None, :] - yn[None, :, :]) ** 2, axis=-1)
    iu = jnp.triu_indices(yn.shape[0], k=1)
    return jnp.log(jnp.mean(jnp.exp(-rbf_t * d2[iu])))


if __name__ == "__main__":
    key = jax.random.PRNGKey(0)
    k_feat, k_w, k_b = jax.random.split(key, 3)

    # Small shapes: bs=2, C=8, H=W=30; pool kernel=stride=2 -> (2, 8, 15, 15)
    # -> M = 450 points.
    bs, c, h, w = 2, 8, 30, 30
    proj_dim = 16
    kernel_size, stride, rbf_t = 2, 2, 2.0

    features = jax.random.normal(k_feat, (bs, c, h, w), dtype=jnp.float32)
    # Deterministic projection_net params (1x1 conv == linear over channels)
    proj_w = jax.random.normal(k_w, (c, proj_dim), dtype=jnp.float32) * 0.1
    proj_b = jax.random.normal(k_b, (proj_dim,), dtype=jnp.float32) * 0.01

    ref = jax.block_until_ready(
        _reference_loss(features, proj_w, proj_b,
                        kernel_size=kernel_size, stride=stride, rbf_t=rbf_t))

    # Default tile (512): M=450 -> single row tile.
    loss_default = jax.block_until_ready(
        uniformity_loss(features, proj_w, proj_b,
                        kernel_size=kernel_size, stride=stride, rbf_t=rbf_t))

    # tile=128: exercises the 4x4 grid, row padding and the across-column
    # accumulation into the resident output block.
    loss_tiled = jax.block_until_ready(
        uniformity_loss(features, proj_w, proj_b,
                        kernel_size=kernel_size, stride=stride, rbf_t=rbf_t,
                        tile=128))

    for loss in (loss_default, loss_tiled):
        err = abs(float(loss) - float(ref))
        assert err <= 1e-3 * abs(float(ref)) + 1.5e-3, (float(loss), float(ref), err)

    print("KERNEL_OK")
</pallas_src>

<mosaic_0001>
module attributes {stable_mosaic.version = 11 : i64} {
  func.func @proj_norm_kernel(%arg0: i32, %arg1: memref<512x128xf32, #tpu.memory_space<vmem>>, %arg2: memref<128x128xf32, #tpu.memory_space<vmem>>, %arg3: memref<1x128xf32, #tpu.memory_space<vmem>>, %arg4: memref<512x128xbf16, #tpu.memory_space<vmem>>, %arg5: memref<512x1xf32, #tpu.memory_space<vmem>>) attributes {dimension_semantics = [#tpu.dimension_semantics<parallel>], iteration_bounds = array<i64: 1>, scalar_prefetch = 0 : i64, scratch_operands = 0 : i64, tpu.core_type = #tpu.core_type<tc>, window_params = [{transform_indices = @transform_0, window_bounds = array<i64: 512, 128>}, {pipeline_mode = #tpu.pipeline_mode<synchronous>, transform_indices = @transform_1, window_bounds = array<i64: 128, 128>}, {pipeline_mode = #tpu.pipeline_mode<synchronous>, transform_indices = @transform_2, window_bounds = array<i64: 1, 128>}, {transform_indices = @transform_3, window_bounds = array<i64: 512, 128>}, {transform_indices = @transform_4, window_bounds = array<i64: 512, 1>}]} {
    %c0 = arith.constant 0 : index
    %c0_0 = arith.constant 0 : index
    %0 = vector.load %arg1[%c0, %c0_0] : memref<512x128xf32, #tpu.memory_space<vmem>>, vector<512x128xf32>
    %c0_1 = arith.constant 0 : index
    %c0_2 = arith.constant 0 : index
    %1 = vector.load %arg2[%c0_1, %c0_2] : memref<128x128xf32, #tpu.memory_space<vmem>>, vector<128x128xf32>
    %cst = arith.constant dense<0.000000e+00> : vector<512x128xf32>
    %2 = tpu.matmul %0, %1, %cst {dimension_numbers = #tpu.dot_dimension_numbers<[1], [0], [0], [1], [0, 0, 1, 1], [], []>} : vector<512x128xf32>, vector<128x128xf32>, vector<512x128xf32> -> vector<512x128xf32>
    %c0_3 = arith.constant 0 : index
    %c0_4 = arith.constant 0 : index
    %3 = vector.load %arg3[%c0_3, %c0_4] : memref<1x128xf32, #tpu.memory_space<vmem>>, vector<1x128xf32>
    %4 = vector.broadcast %3 : vector<1x128xf32> to vector<512x128xf32>
    %5 = arith.addf %2, %4 : vector<512x128xf32>
    %6 = arith.mulf %5, %5 : vector<512x128xf32>
    %cst_5 = arith.constant dense<0.000000e+00> : vector<512xf32>
    %7 = vector.multi_reduction <add>, %6, %cst_5 [1] : vector<512x128xf32> to vector<512xf32>
    %8 = vector.shape_cast %7 : vector<512xf32> to vector<512x1xf32>
    %cst_6 = arith.constant 1.000000e-24 : f32
    %9 = vector.broadcast %cst_6 : f32 to vector<512x1xf32>
    %10 = arith.maximumf %8, %9 : vector<512x1xf32>
    %11 = math.rsqrt %10 : vector<512x1xf32>
    %12 = vector.broadcast %11 : vector<512x1xf32> to vector<512x128xf32>
    %13 = arith.mulf %5, %12 : vector<512x128xf32>
    %cst_7 = arith.constant 2.000000e+00 : f32
    %14 = vector.broadcast %cst_7 : f32 to vector<512x128xf32>
    %15 = arith.mulf %13, %14 : vector<512x128xf32>
    %16 = arith.truncf %15 : vector<512x128xf32> to vector<512x128xbf16>
    %c0_8 = arith.constant 0 : index
    %c0_9 = arith.constant 0 : index
    %17 = vector.load %arg4[%c0_8, %c0_9] : memref<512x128xbf16, #tpu.memory_space<vmem>>, vector<512x128xbf16>
    tpu.vector_store %arg4[%c0_8, %c0_9], %16 {strides = array<i32>} : memref<512x128xbf16, #tpu.memory_space<vmem>>, vector<512x128xbf16>,
    %18 = arith.mulf %11, %11 : vector<512x1xf32>
    %19 = arith.mulf %8, %18 : vector<512x1xf32>
    %c512_i32 = arith.constant 512 : i32
    %20 = arith.muli %arg0, %c512_i32 : i32
    %21 = tpu.iota {dimensions = array<i32: 0>} : vector<512x1xi32>
    %22 = vector.broadcast %20 : i32 to vector<512x1xi32>
    %23 = arith.addi %22, %21 : vector<512x1xi32>
    %c450_i32 = arith.constant 450 : i32
    %24 = vector.broadcast %c450_i32 : i32 to vector<512x1xi32>
    %25 = arith.cmpi slt, %23, %24 : vector<512x1xi32>
    %cst_10 = arith.constant -2.000000e+00 : f32
    %26 = vector.broadcast %cst_10 : f32 to vector<512x1xf32>
    %27 = arith.mulf %26, %19 : vector<512x1xf32>
    %cst_11 = arith.constant -1.000000e+30 : f32
    %28 = vector.broadcast %cst_11 : f32 to vector<512x1xf32>
    %29 = arith.select %25, %27, %28 : vector<512x1xi1>, vector<512x1xf32>
    %c0_12 = arith.constant 0 : index
    %c0_13 = arith.constant 0 : index
    %30 = vector.load %arg5[%c0_12, %c0_13] : memref<512x1xf32, #tpu.memory_space<vmem>>, vector<512x1xf32>
    tpu.vector_store %arg5[%c0_12, %c0_13], %29 {strides = array<i32>} : memref<512x1xf32, #tpu.memory_space<vmem>>, vector<512x1xf32>,
    return
  }
  func.func @transform_0(%arg0: i32) -> (i32, i32) {
    %c0_i32 = arith.constant 0 : i32
    %c0_i32_0 = arith.constant 0 : i32
    return %arg0, %c0_i32 : i32, i32
  }
  func.func @transform_1(%arg0: i32) -> (i32, i32) {
    %c0_i32 = arith.constant 0 : i32
    %c0_i32_0 = arith.constant 0 : i32
    %c0_i32_1 = arith.constant 0 : i32
    return %c0_i32, %c0_i32_0 : i32, i32
  }
  func.func @transform_2(%arg0: i32) -> (i32, i32) {
    %c0_i32 = arith.constant 0 : i32
    %c0_i32_0 = arith.constant 0 : i32
    %c0_i32_1 = arith.constant 0 : i32
    return %c0_i32, %c0_i32_0 : i32, i32
  }
  func.func @transform_3(%arg0: i32) -> (i32, i32) {
    %c0_i32 = arith.constant 0 : i32
    %c0_i32_0 = arith.constant 0 : i32
    return %arg0, %c0_i32 : i32, i32
  }
  func.func @transform_4(%arg0: i32) -> (i32, i32) {
    %c0_i32 = arith.constant 0 : i32
    %c0_i32_0 = arith.constant 0 : i32
    return %arg0, %c0_i32 : i32, i32
  }
}

</mosaic_0001>

<bundles_post_ra>
// kernel: tpu_custom_call.1
= control target key start
LH: loop header
LB: loop body
LE: loop exit
PB: predicated region body
PF: predicated region fallthrough
CT: control target
= control target key end

     0   :  { %10 = vsyncpa [#allocation3], 0  ;;  %s3497_s0 = inlined_call_operand.hbm [shape: f32[512,128], index: 0, kind: input, shape index: {}]   ;;  %s3498_s1 = inlined_call_operand.hbm [shape: f32[128,128], index: 1, kind: input, shape index: {}]   ;;  %s3499_s2 = inlined_call_operand.vmem [shape: f32[1,128], index: 2, kind: input, shape index: {}]   ;;  %s3500_s3 = inlined_call_operand.hbm [shape: bf16[512,128], index: 3, kind: output, shape index: {0}]   ;;  %s3501_s4 = inlined_call_operand.vmem [shape: f32[512,1], index: 4, kind: output, shape index: {1}]  }
   0x1   :  { %11 = vsyncpa [#allocation6], 0 }
   0x2   :  { %12 = vsyncpa [#allocation4], 0  ;;  %s2585_s15 = smov [#allocation2]  }
   0x3   :  { %s18_s16 = sshll.u32 %s2585_s15, 4  ;;  %s19_s16 = int_to_ptr.vmem [resolvable:$true] %s18_s16 }
   0x4   :  { %s2527_s17 = scalar_lea.vmem %s19_s16, 8192  ;;  %p2532_p1 = scmp.lt.s32.totalorder %s19_s16, %s19_s16 }
   0x5   :  { %p2528_p0 = scmp.ne.s32.totalorder %s19_s16, %s2527_s17  ;;  %p2533_p2 = scmp.lt.s32.totalorder %s2527_s17, %s2527_s17 }
   0x7   :  { %p2534_p3 = por %p2533_p2, %p2532_p1 }
   0x9   :  { %p2535_p4 = pnand %p2534_p3, %p2528_p0 }
   0xb   :  { %2538 = shalt.err (!%p2535_p4)
}
   0xc   :  { %s2586_s18 = smov 128   ;;  %s2587_s19 = smov 8  }
   0xd   :  { %24 = dma.hbm_to_vmem [thread:$0]  %s3497_s0, 8192, %s19_s16, [#allocation3], %s2586_s18, %s2586_s18, %s2587_s19  }
   0xe   :  { %s2588_s22 = smov [#allocation5]  }
   0xf   :  { %s30_s23 = sshll.u32 %s2588_s22, 4  ;;  %s31_s23 = int_to_ptr.vmem [resolvable:$true] %s30_s23 }
  0x10   :  { %s2547_s24 = scalar_lea.vmem %s31_s23, 2048  ;;  %p2552_p6 = scmp.lt.s32.totalorder %s31_s23, %s31_s23 }
  0x11   :  { %p2548_p5 = scmp.ne.s32.totalorder %s31_s23, %s2547_s24  ;;  %p2553_p7 = scmp.lt.s32.totalorder %s2547_s24, %s2547_s24 }
  0x13   :  { %p2554_p8 = por %p2553_p7, %p2552_p6 }
  0x15   :  { %p2555_p9 = pnand %p2554_p8, %p2548_p5 }
  0x17   :  { %2558 = shalt.err (!%p2555_p9)
}
  0x18   :  { %36 = dma.hbm_to_vmem [thread:$0]  %s3498_s1, 2048, %s31_s23, [#allocation6], %s2586_s18, %s2586_s18, %s2587_s19  }
  0x19   :  { %2579 = dma.done.wait [#allocation3], 8192  }
  0x1a   :  { %2580 = vsyncadd [#allocation3], 4294959104 }
  0x1b   :  { %2581 = dma.done.wait [#allocation6], 2048  }
  0x1c   :  { %2582 = vsyncadd [#allocation6], 4294965248  ;;  %vm1736_vm0 = vcmask 7168   ;;  %v2589_v0 = vmov -1e+30   ;;  %v124_v1 = vld [vmem:[#allocation5 + $0x78] sm:$0xff] }
  0x1d   :  { %1794 = vst.msk [vmem:[%s3501_s4 + $0x1c8] sm:$0xff] %vm1736_vm0, %v2589_v0  ;;  %1795 = vst.msk [vmem:[%s3501_s4 + $0x1d0] sm:$0xff] %vm1736_vm0, %v2589_v0  ;;  %v123_v2 = vld [vmem:[#allocation5 + $0x70] sm:$0xff]  ;;  %2223 = vmatprep.subr.mxu0 %v124_v1  ;;  %2351 = vmatprep.subr.mxu1 %v124_v1  ;;  %v122_v3 = vld [vmem:[#allocation5 + $0x68] sm:$0xff]  ;;  %s2590_s9 = smov [#allocation7]  }
  0x1e   :  { %1796 = vst.msk [vmem:[%s3501_s4 + $0x1d8] sm:$0xff] %vm1736_vm0, %v2589_v0  ;;  %1797 = vst.msk [vmem:[%s3501_s4 + $0x1e0] sm:$0xff] %vm1736_vm0, %v2589_v0  ;;  %2224 = vmatpush3.msra.mxu0 %v124_v1  ;;  %2367 = vmatpush3.msra.mxu1 %v124_v1  ;;  %v121_v4 = vld [vmem:[#allocation5 + $0x60] sm:$0xff]  ;;  %v120_v5 = vld [vmem:[#allocation5 + $0x58] sm:$0xff]  ;;  %s1806_s10 = sshll.u32 %s2590_s9, 4  ;;  %s1807_s10 = int_to_ptr.vmem [resolvable:$true] %s1806_s10 }
  0x1f   :  { %1798 = vst.msk [vmem:[%s3501_s4 + $0x1e8] sm:$0xff] %vm1736_vm0, %v2589_v0  ;;  %1799 = vst.msk [vmem:[%s3501_s4 + $0x1f0] sm:$0xff] %vm1736_vm0, %v2589_v0  ;;  %2225 = vmatprep.subr.mxu0 %v123_v2  ;;  %2352 = vmatprep.subr.mxu1 %v123_v2  ;;  %v119_v6 = vld [vmem:[#allocation5 + $0x50] sm:$0xff]  ;;  %v118_v7 = vld [vmem:[#allocation5 + $0x48] sm:$0xff]  ;;  %p2564_p11 = scmp.lt.s32.totalorder %s1807_s10, %s1807_s10 }
  0x20   :  { %1800 = vst.msk [vmem:[%s3501_s4 + $0x1f8] sm:$0xff] %vm1736_vm0, %v2589_v0  ;;  %2226 = vmatpush3.msra.mxu0 %v123_v2  ;;  %2368 = vmatpush3.msra.mxu1 %v123_v2  ;;  %v117_v8 = vld [vmem:[#allocation5 + $0x40] sm:$0xff]  ;;  %v116_v9 = vld [vmem:[#allocation5 + $0x38] sm:$0xff]  ;;  %v115_v10 = vld [vmem:[#allocation5 + $0x30] sm:$0xff] }
  0x21   :  { %2227 = vmatprep.subr.mxu0 %v122_v3  ;;  %2353 = vmatprep.subr.mxu1 %v122_v3  ;;  %v114_v11 = vld [vmem:[#allocation5 + $0x28] sm:$0xff]  ;;  %v113_v12 = vld [vmem:[#allocation5 + $0x20] sm:$0xff]  ;;  %v112_v13 = vld [vmem:[#allocation5 + $0x18] sm:$0xff] }
  0x22   :  { %2228 = vmatpush3.msra.mxu0 %v122_v3  ;;  %2369 = vmatpush3.msra.mxu1 %v122_v3  ;;  %v111_v14 = vld [vmem:[#allocation5 + $0x10] sm:$0xff]  ;;  %v110_v15 = vld [vmem:[#allocation5 + $0x8] sm:$0xff]  ;;  %v109_v16 = vld [vmem:[#allocation5] sm:$0xff] }
  0x23   :  { %2229 = vmatprep.subr.mxu0 %v121_v4  ;;  %2354 = vmatprep.subr.mxu1 %v121_v4  ;;  %v45_v17 = vld [vmem:[#allocation2] sm:$0xff]  ;;  %v46_v19 = vld [vmem:[#allocation2 + $0x8] sm:$0xff]  ;;  %v47_v21 = vld [vmem:[#allocation2 + $0x10] sm:$0xff] }
  0x24   :  { %2230 = vmatpush3.msra.mxu0 %v121_v4  ;;  %2370 = vmatpush3.msra.mxu1 %v121_v4  ;;  %v77_v18 = vld [vmem:[#allocation2 + $0x100] sm:$0xff]  ;;  %v78_v20 = vld [vmem:[#allocation2 + $0x108] sm:$0xff]  ;;  %v79_v22 = vld [vmem:[#allocation2 + $0x110] sm:$0xff] }
  0x25   :  { %2231 = vmatprep.subr.mxu0 %v120_v5  ;;  %2355 = vmatprep.subr.mxu1 %v120_v5  ;;  %v48_v23 = vld [vmem:[#allocation2 + $0x18] sm:$0xff]  ;;  %v49_v25 = vld [vmem:[#allocation2 + $0x20] sm:$0xff]  ;;  %v50_v27 = vld [vmem:[#allocation2 + $0x28] sm:$0xff] }
  0x26   :  { %2232 = vmatpush3.msra.mxu0 %v120_v5  ;;  %2371 = vmatpush3.msra.mxu1 %v120_v5  ;;  %v80_v24 = vld [vmem:[#allocation2 + $0x118] sm:$0xff]  ;;  %v81_v26 = vld [vmem:[#allocation2 + $0x120] sm:$0xff]  ;;  %v82_v28 = vld [vmem:[#allocation2 + $0x128] sm:$0xff] }
  0x27   :  { %2233 = vmatprep.subr.mxu0 %v119_v6  ;;  %2356 = vmatprep.subr.mxu1 %v119_v6  ;;  %v51_v29 = vld [vmem:[#allocation2 + $0x30] sm:$0xff]  ;;  %v52_v31 = vld [vmem:[#allocation2 + $0x38] sm:$0xff]  ;;  %v53_v33 = vld [vmem:[#allocation2 + $0x40] sm:$0xff] }
  0x28   :  { %2234 = vmatpush3.msra.mxu0 %v119_v6  ;;  %2372 = vmatpush3.msra.mxu1 %v119_v6  ;;  %v83_v30 = vld [vmem:[#allocation2 + $0x130] sm:$0xff]  ;;  %v84_v32 = vld [vmem:[#allocation2 + $0x138] sm:$0xff]  ;;  %v85_v34 = vld [vmem:[#allocation2 + $0x140] sm:$0xff] }
  0x29   :  { %2235 = vmatprep.subr.mxu0 %v118_v7  ;;  %2357 = vmatprep.subr.mxu1 %v118_v7  ;;  %v54_v35 = vld [vmem:[#allocation2 + $0x48] sm:$0xff]  ;;  %v55_v37 = vld [vmem:[#allocation2 + $0x50] sm:$0xff]  ;;  %v56_v39 = vld [vmem:[#allocation2 + $0x58] sm:$0xff] }
  0x2a   :  { %2236 = vmatpush3.msra.mxu0 %v118_v7  ;;  %2373 = vmatpush3.msra.mxu1 %v118_v7  ;;  %v86_v36 = vld [vmem:[#allocation2 + $0x148] sm:$0xff]  ;;  %v87_v38 = vld [vmem:[#allocation2 + $0x150] sm:$0xff]  ;;  %v88_v40 = vld [vmem:[#allocation2 + $0x158] sm:$0xff] }
  0x2b   :  { %2237 = vmatprep.subr.mxu0 %v117_v8  ;;  %2358 = vmatprep.subr.mxu1 %v117_v8  ;;  %v57_v41 = vld [vmem:[#allocation2 + $0x60] sm:$0xff]  ;;  %v58_v43 = vld [vmem:[#allocation2 + $0x68] sm:$0xff]  ;;  %v59_v45 = vld [vmem:[#allocation2 + $0x70] sm:$0xff] }
  0x2c   :  { %2238 = vmatpush3.msra.mxu0 %v117_v8  ;;  %2374 = vmatpush3.msra.mxu1 %v117_v8  ;;  %v89_v42 = vld [vmem:[#allocation2 + $0x160] sm:$0xff]  ;;  %v90_v44 = vld [vmem:[#allocation2 + $0x168] sm:$0xff]  ;;  %v91_v46 = vld [vmem:[#allocation2 + $0x170] sm:$0xff] }
  0x2d   :  { %2239 = vmatprep.subr.mxu0 %v116_v9  ;;  %2359 = vmatprep.subr.mxu1 %v116_v9  ;;  %v60_v47 = vld [vmem:[#allocation2 + $0x78] sm:$0xff]  ;;  %v61_v49 = vld [vmem:[#allocation2 + $0x80] sm:$0xff]  ;;  %v62_v51 = vld [vmem:[#allocation2 + $0x88] sm:$0xff] }
  0x2e   :  { %2240 = vmatpush3.msra.mxu0 %v116_v9  ;;  %2375 = vmatpush3.msra.mxu1 %v116_v9  ;;  %v92_v48 = vld [vmem:[#allocation2 + $0x178] sm:$0xff]  ;;  %v93_v50 = vld [vmem:[#allocation2 + $0x180] sm:$0xff]  ;;  %v94_v52 = vld [vmem:[#allocation2 + $0x188] sm:$0xff] }
  0x2f   :  { %2241 = vmatprep.subr.mxu0 %v115_v10  ;;  %2360 = vmatprep.subr.mxu1 %v115_v10  ;;  %v63_v53 = vld [vmem:[#allocation2 + $0x90] sm:$0xff]  ;;  %v64_v55 = vld [vmem:[#allocation2 + $0x98] sm:$0xff]  ;;  %v65_v57 = vld [vmem:[#allocation2 + $0xa0] sm:$0xff] }
  0x30   :  { %2242 = vmatpush3.msra.mxu0 %v115_v10  ;;  %2376 = vmatpush3.msra.mxu1 %v115_v10  ;;  %v95_v54 = vld [vmem:[#allocation2 + $0x190] sm:$0xff]  ;;  %v96_v56 = vld [vmem:[#allocation2 + $0x198] sm:$0xff]  ;;  %v97_v58 = vld [vmem:[#allocation2 + $0x1a0] sm:$0xff] }
  0x31   :  { %2243 = vmatprep.subr.mxu0 %v114_v11  ;;  %2361 = vmatprep.subr.mxu1 %v114_v11  ;;  %v66_v59 = vld [vmem:[#allocation2 + $0xa8] sm:$0xff]  ;;  %v67_v61 = vld [vmem:[#allocation2 + $0xb0] sm:$0xff]  ;;  %v68_v63 = vld [vmem:[#allocation2 + $0xb8] sm:$0xff] }
  0x32   :  { %2244 = vmatpush3.msra.mxu0 %v114_v11  ;;  %2377 = vmatpush3.msra.mxu1 %v114_v11  ;;  %v98_v60 = vld [vmem:[#allocation2 + $0x1a8] sm:$0xff]  ;;  %v99_v62 = vld [vmem:[#allocation2 + $0x1b0] sm:$0xff]  ;;  %v100_v0 = vld [vmem:[#allocation2 + $0x1b8] sm:$0xff] }
  0x33   :  { %2245 = vmatprep.subr.mxu0 %v113_v12  ;;  %2362 = vmatprep.subr.mxu1 %v113_v12  ;;  %v69_v1 = vld [vmem:[#allocation2 + $0xc0] sm:$0xff]  ;;  %v70_v3 = vld [vmem:[#allocation2 + $0xc8] sm:$0xff]  ;;  %v71_v5 = vld [vmem:[#allocation2 + $0xd0] sm:$0xff] }
  0x34   :  { %2246 = vmatpush3.msra.mxu0 %v113_v12  ;;  %2378 = vmatpush3.msra.mxu1 %v113_v12  ;;  %v101_v2 = vld [vmem:[#allocation2 + $0x1c0] sm:$0xff]  ;;  %v102_v4 = vld [vmem:[#allocation2 + $0x1c8] sm:$0xff]  ;;  %v103_v6 = vld [vmem:[#allocation2 + $0x1d0] sm:$0xff] }
  0x35   :  { %2247 = vmatprep.subr.mxu0 %v112_v13  ;;  %2363 = vmatprep.subr.mxu1 %v112_v13  ;;  %v72_v7 = vld [vmem:[#allocation2 + $0xd8] sm:$0xff]  ;;  %v73_v9 = vld [vmem:[#allocation2 + $0xe0] sm:$0xff]  ;;  %v74_v11 = vld [vmem:[#allocation2 + $0xe8] sm:$0xff] }
  0x36   :  { %2248 = vmatpush3.msra.mxu0 %v112_v13  ;;  %2379 = vmatpush3.msra.mxu1 %v112_v13  ;;  %v104_v8 = vld [vmem:[#allocation2 + $0x1d8] sm:$0xff]  ;;  %v105_v10 = vld [vmem:[#allocation2 + $0x1e0] sm:$0xff]  ;;  %v106_v12 = vld [vmem:[#allocation2 + $0x1e8] sm:$0xff] }
  0x37   :  { %2249 = vmatprep.subr.mxu0 %v111_v14  ;;  %2364 = vmatprep.subr.mxu1 %v111_v14  ;;  %v75_v13 = vld [vmem:[#allocation2 + $0xf0] sm:$0xff] }
  0x38   :  { %2250 = vmatpush3.msra.mxu0 %v111_v14  ;;  %2380 = vmatpush3.msra.mxu1 %v111_v14  ;;  %v107_v14 = vld [vmem:[#allocation2 + $0x1f0] sm:$0xff] }
  0x39   :  { %2251 = vmatprep.subr.mxu0 %v110_v15  ;;  %2365 = vmatprep.subr.mxu1 %v110_v15 }
  0x3a   :  { %2252 = vmatpush3.msra.mxu0 %v110_v15  ;;  %2381 = vmatpush3.msra.mxu1 %v110_v15  ;;  %v76_v15 = vld [vmem:[#allocation2 + $0xf8] sm:$0xff] }
  0x3b   :  { %2253 = vmatprep.subr.mxu0 %v109_v16  ;;  %2366 = vmatprep.subr.mxu1 %v109_v16 }
  0x3c   :  { %2254 = vmatpush3.msra.mxu0 %v109_v16  ;;  %2382 = vmatpush3.msra.mxu1 %v109_v16  ;;  %v108_v16 = vld [vmem:[#allocation2 + $0x1f8] sm:$0xff] }
  0x3d   :  { %2255 = vmatprep.mubr.f32.mxu0 %v45_v17  ;;  %2303 = vmatprep.mubr.f32.mxu1 %v77_v18  ;;  %v2655_v17 = vld [vmem:[%s3499_s2] ss:$0 sm:$0xff]  ;;  %s2559_s2 = scalar_lea.vmem %s1807_s10, 4096 }
  0x3e   :  { %2256 = vmatmul.mubr.f32.vlgmr.msra.gmra.mxu0 %v46_v19  ;;  %2304 = vmatmul.mubr.f32.vlgmr.msra.gmra.mxu1 %v78_v20  ;;  %p2560_p10 = scmp.ne.s32.totalorder %s1807_s10, %s2559_s2  ;;  %p2565_p12 = scmp.lt.s32.totalorder %s2559_s2, %s2559_s2 }
  0x3f   :  { %2258 = vmatprep.mubr.f32.mxu0 %v47_v21  ;;  %2306 = vmatprep.mubr.f32.mxu1 %v79_v22 }
  0x40   :  { %p2566_p13 = por %p2565_p12, %p2564_p11 }
  0x42   :  { %2259 = vmatmul.mubr.f32.gmra.mxu0 %v48_v23  ;;  %2307 = vmatmul.mubr.f32.gmra.mxu1 %v80_v24  ;;  %p2567_p0 = pnand %p2566_p13, %p2560_p10 }
  0x43   :  { %2261 = vmatprep.mubr.f32.mxu0 %v49_v25  ;;  %2309 = vmatprep.mubr.f32.mxu1 %v81_v26 }
  0x46   :  { %2262 = vmatmul.mubr.f32.gmra.mxu0 %v50_v27  ;;  %2310 = vmatmul.mubr.f32.gmra.mxu1 %v82_v28 }
  0x47   :  { %2264 = vmatprep.mubr.f32.mxu0 %v51_v29  ;;  %2312 = vmatprep.mubr.f32.mxu1 %v83_v30 }
  0x4a   :  { %2265 = vmatmul.mubr.f32.gmra.mxu0 %v52_v31  ;;  %2313 = vmatmul.mubr.f32.gmra.mxu1 %v84_v32 }
  0x4b   :  { %2267 = vmatprep.mubr.f32.mxu0 %v53_v33  ;;  %2315 = vmatprep.mubr.f32.mxu1 %v85_v34 }
  0x4e   :  { %2268 = vmatmul.mubr.f32.gmra.mxu0 %v54_v35  ;;  %2316 = vmatmul.mubr.f32.gmra.mxu1 %v86_v36 }
  0x4f   :  { %2270 = vmatprep.mubr.f32.mxu0 %v55_v37  ;;  %2318 = vmatprep.mubr.f32.mxu1 %v87_v38 }
  0x52   :  { %2271 = vmatmul.mubr.f32.gmra.mxu0 %v56_v39  ;;  %2319 = vmatmul.mubr.f32.gmra.mxu1 %v88_v40 }
  0x53   :  { %2273 = vmatprep.mubr.f32.mxu0 %v57_v41  ;;  %2321 = vmatprep.mubr.f32.mxu1 %v89_v42 }
  0x56   :  { %2274 = vmatmul.mubr.f32.gmra.mxu0 %v58_v43  ;;  %2322 = vmatmul.mubr.f32.gmra.mxu1 %v90_v44 }
  0x57   :  { %2276 = vmatprep.mubr.f32.mxu0 %v59_v45  ;;  %2324 = vmatprep.mubr.f32.mxu1 %v91_v46 }
  0x5a   :  { %2277 = vmatmul.mubr.f32.gmra.mxu0 %v60_v47  ;;  %2325 = vmatmul.mubr.f32.gmra.mxu1 %v92_v48 }
  0x5b   :  { %2279 = vmatprep.mubr.f32.mxu0 %v61_v49  ;;  %2327 = vmatprep.mubr.f32.mxu1 %v93_v50 }
  0x5e   :  { %2280 = vmatmul.mubr.f32.gmra.mxu0 %v62_v51  ;;  %2328 = vmatmul.mubr.f32.gmra.mxu1 %v94_v52 }
  0x5f   :  { %2282 = vmatprep.mubr.f32.mxu0 %v63_v53  ;;  %2330 = vmatprep.mubr.f32.mxu1 %v95_v54 }
  0x62   :  { %2283 = vmatmul.mubr.f32.gmra.mxu0 %v64_v55  ;;  %2331 = vmatmul.mubr.f32.gmra.mxu1 %v96_v56 }
  0x63   :  { %2285 = vmatprep.mubr.f32.mxu0 %v65_v57  ;;  %2333 = vmatprep.mubr.f32.mxu1 %v97_v58 }
  0x66   :  { %2286 = vmatmul.mubr.f32.gmra.mxu0 %v66_v59  ;;  %2334 = vmatmul.mubr.f32.gmra.mxu1 %v98_v60 }
  0x67   :  { %2288 = vmatprep.mubr.f32.mxu0 %v67_v61  ;;  %2336 = vmatprep.mubr.f32.mxu1 %v99_v62 }
  0x6a   :  { %2289 = vmatmul.mubr.f32.gmra.mxu0 %v68_v63  ;;  %2337 = vmatmul.mubr.f32.gmra.mxu1 %v100_v0 }
  0x6b   :  { %2291 = vmatprep.mubr.f32.mxu0 %v69_v1  ;;  %2339 = vmatprep.mubr.f32.mxu1 %v101_v2 }
  0x6e   :  { %2292 = vmatmul.mubr.f32.gmra.mxu0 %v70_v3  ;;  %2340 = vmatmul.mubr.f32.gmra.mxu1 %v102_v4 }
  0x6f   :  { %2294 = vmatprep.mubr.f32.mxu0 %v71_v5  ;;  %2342 = vmatprep.mubr.f32.mxu1 %v103_v6 }
  0x72   :  { %2295 = vmatmul.mubr.f32.gmra.mxu0 %v72_v7  ;;  %2343 = vmatmul.mubr.f32.gmra.mxu1 %v104_v8 }
  0x73   :  { %2297 = vmatprep.mubr.f32.mxu0 %v73_v9  ;;  %2345 = vmatprep.mubr.f32.mxu1 %v105_v10 }
  0x76   :  { %2298 = vmatmul.mubr.f32.gmra.mxu0 %v74_v11  ;;  %2346 = vmatmul.mubr.f32.gmra.mxu1 %v106_v12 }
  0x77   :  { %2300 = vmatprep.mubr.f32.mxu0 %v75_v13  ;;  %2348 = vmatprep.mubr.f32.mxu1 %v107_v14 }
  0x7a   :  { %2301 = vmatmul.mubr.f32.gmra.mxu0 %v76_v15  ;;  %2349 = vmatmul.mubr.f32.gmra.mxu1 %v108_v16 }
  0xfe   :  { %v2257_v18 = vpop.f32.mrf.mxu0  ;;  %v2305_v19 = vpop.f32.mrf.mxu1 }
  0xff   :  { %v2658_v20 = vadd.f32 %v2257_v18, %v2655_v17  ;;  %v2661_v21 = vadd.f32 %v2305_v19, %v2655_v17 }
 0x100   :  { %v198_v22 = vpop.f32.mrf.mxu0  ;;  %v358_v23 = vpop.f32.mrf.mxu1 }
 0x101   :  { %v2664_v24 = vadd.f32 %v2655_v17, %v198_v22  ;;  %v550_v25 = vmul.f32 %v2661_v21, %v2661_v21  ;;  %v518_v26 = vmul.f32 %v2658_v20, %v2658_v20  ;;  %v2677_v32 = vadd.f32 %v2655_v17, %v358_v23 }
 0x102   :  { %v2260_v27 = vpop.f32.mrf.mxu0  ;;  %v2308_v28 = vpop.f32.mrf.mxu1 }
 0x103   :  { %v2671_v29 = vadd.f32 %v2260_v27, %v2655_v17  ;;  %647 = vadd.xlane.f32.xlu1 %v550_v25  ;;  %583 = vadd.xlane.f32.xlu0 %v518_v26  ;;  %v2674_v30 = vadd.f32 %v2308_v28, %v2655_v17  ;;  %v517_v34 = vmul.f32 %v2664_v24, %v2664_v24 }
 0x104   :  { %v208_v31 = vpop.f32.mrf.mxu0  ;;  %v368_v35 = vpop.f32.mrf.mxu1  ;;  %v549_v40 = vmul.f32 %v2677_v32, %v2677_v32 }
 0x105   :  { %v520_v33 = vmul.f32 %v2671_v29, %v2671_v29  ;;  %v552_v37 = vmul.f32 %v2674_v30, %v2674_v30  ;;  %v2686_v38 = vadd.f32 %v2655_v17, %v208_v31  ;;  %v2689_v39 = vadd.f32 %v2655_v17, %v368_v35 }
 0x106   :  { %v2263_v36 = vpop.f32.mrf.mxu0  ;;  %v2311_v42 = vpop.f32.mrf.mxu1 }
 0x107   :  { %587 = vadd.xlane.f32.xlu1 %v520_v33  ;;  %581 = vadd.xlane.f32.xlu0 %v517_v34  ;;  %v2694_v43 = vadd.f32 %v2263_v36, %v2655_v17  ;;  %v519_v45 = vmul.f32 %v2686_v38, %v2686_v38  ;;  %v551_v46 = vmul.f32 %v2689_v39, %v2689_v39 }
 0x108   :  { %v218_v41 = vpop.f32.mrf.mxu0  ;;  %v378_v47 = vpop.f32.mrf.mxu1  ;;  %v2704_v49 = vadd.f32 %v2311_v42, %v2655_v17 }
 0x109   :  { %v2697_v44 = vadd.f32 %v2655_v17, %v218_v41  ;;  %v2707_v50 = vadd.f32 %v2655_v17, %v378_v47  ;;  %v522_v51 = vmul.f32 %v2694_v43, %v2694_v43 }
 0x10a   :  { %v2266_v48 = vpop.f32.mrf.mxu0  ;;  %v2314_v54 = vpop.f32.mrf.mxu1  ;;  %v554_v57 = vmul.f32 %v2704_v49, %v2704_v49 }
 0x10b   :  { %651 = vadd.xlane.f32.xlu1 %v552_v37  ;;  %645 = vadd.xlane.f32.xlu0 %v549_v40  ;;  %v521_v52 = vmul.f32 %v2697_v44, %v2697_v44  ;;  %v2714_v55 = vadd.f32 %v2266_v48, %v2655_v17  ;;  %v553_v58 = vmul.f32 %v2707_v50, %v2707_v50 }
 0x10c   :  { %v228_v53 = vpop.f32.mrf.mxu0  ;;  %v388_v59 = vpop.f32.mrf.mxu1  ;;  %v2724_v61 = vadd.f32 %v2314_v54, %v2655_v17 }
 0x10d   :  { %v2717_v56 = vadd.f32 %v2655_v17, %v228_v53  ;;  %v2727_v62 = vadd.f32 %v2655_v17, %v388_v59  ;;  %v524_v63 = vmul.f32 %v2714_v55, %v2714_v55 }
 0x10e   :  { %v2269_v60 = vpop.f32.mrf.mxu0  ;;  %v2317_v2 = vpop.f32.mrf.mxu1  ;;  %v556_v5 = vmul.f32 %v2724_v61, %v2724_v61 }
 0x10f   :  { %585 = vadd.xlane.f32.xlu1 %v519_v45  ;;  %649 = vadd.xlane.f32.xlu0 %v551_v46  ;;  %v523_v0 = vmul.f32 %v2717_v56, %v2717_v56  ;;  %v2734_v3 = vadd.f32 %v2269_v60, %v2655_v17  ;;  %v555_v6 = vmul.f32 %v2727_v62, %v2727_v62 }
 0x110   :  { %v238_v1 = vpop.f32.mrf.mxu0  ;;  %v398_v7 = vpop.f32.mrf.mxu1  ;;  %v2744_v9 = vadd.f32 %v2317_v2, %v2655_v17 }
 0x111   :  { %v2737_v4 = vadd.f32 %v2655_v17, %v238_v1  ;;  %v2747_v10 = vadd.f32 %v2655_v17, %v398_v7  ;;  %v526_v11 = vmul.f32 %v2734_v3, %v2734_v3 }
 0x112   :  { %v2272_v8 = vpop.f32.mrf.mxu0  ;;  %v2320_v14 = vpop.f32.mrf.mxu1  ;;  %v558_v18 = vmul.f32 %v2744_v9, %v2744_v9 }
 0x113   :  { %591 = vadd.xlane.f32.xlu1 %v522_v51  ;;  %589 = vadd.xlane.f32.xlu0 %v521_v52  ;;  %v525_v12 = vmul.f32 %v2737_v4, %v2737_v4  ;;  %v2754_v15 = vadd.f32 %v2272_v8, %v2655_v17  ;;  %v557_v19 = vmul.f32 %v2747_v10, %v2747_v10 }
 0x114   :  { %v248_v13 = vpop.f32.mrf.mxu0  ;;  %v408_v22 = vpop.f32.mrf.mxu1  ;;  %v2764_v25 = vadd.f32 %v2320_v14, %v2655_v17 }
 0x115   :  { %v2757_v16 = vadd.f32 %v2655_v17, %v248_v13  ;;  %v2767_v26 = vadd.f32 %v2655_v17, %v408_v22  ;;  %v528_v27 = vmul.f32 %v2754_v15, %v2754_v15 }
 0x116   :  { %v2275_v23 = vpop.f32.mrf.mxu0  ;;  %v2323_v33 = vpop.f32.mrf.mxu1  ;;  %v560_v36 = vmul.f32 %v2764_v25, %v2764_v25 }
 0x117   :  { %655 = vadd.xlane.f32.xlu1 %v554_v57  ;;  %653 = vadd.xlane.f32.xlu0 %v553_v58  ;;  %v527_v28 = vmul.f32 %v2757_v16, %v2757_v16  ;;  %v2774_v34 = vadd.f32 %v2275_v23, %v2655_v17  ;;  %v559_v37 = vmul.f32 %v2767_v26, %v2767_v26 }
 0x118   :  { %v258_v31 = vpop.f32.mrf.mxu0  ;;  %v418_v40 = vpop.f32.mrf.mxu1  ;;  %v2784_v42 = vadd.f32 %v2323_v33, %v2655_v17 }
 0x119   :  { %v2777_v35 = vadd.f32 %v2655_v17, %v258_v31  ;;  %v2787_v45 = vadd.f32 %v2655_v17, %v418_v40  ;;  %v530_v46 = vmul.f32 %v2774_v34, %v2774_v34 }
 0x11a   :  { %v2278_v41 = vpop.f32.mrf.mxu0  ;;  %v2326_v51 = vpop.f32.mrf.mxu1  ;;  %v562_v54 = vmul.f32 %v2784_v42, %v2784_v42 }
 0x11b   :  { %595 = vadd.xlane.f32.xlu1 %v524_v63  ;;  %593 = vadd.xlane.f32.xlu0 %v523_v0  ;;  %v529_v47 = vmul.f32 %v2777_v35, %v2777_v35  ;;  %v2794_v52 = vadd.f32 %v2278_v41, %v2655_v17  ;;  %v561_v57 = vmul.f32 %v2787_v45, %v2787_v45 }
 0x11c   :  { %v268_v48 = vpop.f32.mrf.mxu0  ;;  %v428_v58 = vpop.f32.mrf.mxu1  ;;  %v2804_v60 = vadd.f32 %v2326_v51, %v2655_v17 }
 0x11d   :  { %v2797_v53 = vadd.f32 %v2655_v17, %v268_v48  ;;  %v2807_v63 = vadd.f32 %v2655_v17, %v428_v58  ;;  %v532_v0 = vmul.f32 %v2794_v52, %v2794_v52 }
 0x11e   :  { %v2281_v59 = vpop.f32.mrf.mxu0  ;;  %v564_v8 = vmul.f32 %v2804_v60, %v2804_v60 }
 0x11f   :  { %659 = vadd.xlane.f32.xlu1 %v556_v5  ;;  %657 = vadd.xlane.f32.xlu0 %v555_v6  ;;  %v531_v1 = vmul.f32 %v2797_v53, %v2797_v53  ;;  %v2329_v5 = vpop.f32.mrf.mxu1  ;;  %v2814_v6 = vadd.f32 %v2281_v59, %v2655_v17 }
 0x120   :  { %v278_v2 = vpop.f32.mrf.mxu0  ;;  %v2824_v14 = vadd.f32 %v2329_v5, %v2655_v17 }
 0x121   :  { %v2817_v7 = vadd.f32 %v2655_v17, %v278_v2 }
 0x122   :  { %v2284_v13 = vpop.f32.mrf.mxu0  ;;  %v566_v33 = vmul.f32 %v2824_v14, %v2824_v14 }
 0x123   :  { %599 = vadd.xlane.f32.xlu1 %v526_v11  ;;  %597 = vadd.xlane.f32.xlu0 %v525_v12  ;;  %v563_v11 = vmul.f32 %v2807_v63, %v2807_v63  ;;  %v438_v12 = vpop.f32.mrf.mxu1  ;;  %v533_v22 = vmul.f32 %v2817_v7, %v2817_v7 }
 0x124   :  { %v288_v23 = vpop.f32.mrf.mxu0 }
 0x125   :  { %v2837_v31 = vadd.f32 %v2655_v17, %v288_v23 }
 0x126   :  { %v2287_v40 = vpop.f32.mrf.mxu0 }
 0x127   :  { %663 = vadd.xlane.f32.xlu1 %v558_v18  ;;  %661 = vadd.xlane.f32.xlu0 %v557_v19  ;;  %v2827_v18 = vadd.f32 %v2655_v17, %v438_v12  ;;  %v534_v19 = vmul.f32 %v2814_v6, %v2814_v6  ;;  %3533 = vst [vmem:[#allocation13_spill] sm:$0xff] %v2837_v31 }
 0x128   :  { %v535_v48 = vmul.f32 %v2837_v31, %v2837_v31  ;;  %v298_v51 = vpop.f32.mrf.mxu0 }
 0x129   :  { %3531 = vst [vmem:[#allocation11_spill] sm:$0xff] %v2827_v18  ;;  %v2857_v58 = vadd.f32 %v2655_v17, %v298_v51 }
 0x12a   :  { %v2290_v2 = vpop.f32.mrf.mxu0 }
 0x12b   :  { %603 = vadd.xlane.f32.xlu1 %v528_v27  ;;  %601 = vadd.xlane.f32.xlu0 %v527_v28  ;;  %v2332_v27 = vpop.f32.mrf.mxu1  ;;  %v2834_v28 = vadd.f32 %v2284_v13, %v2655_v17  ;;  %3537 = vst [vmem:[#allocation17_spill] sm:$0xff] %v2857_v58  ;;  %v537_v12 = vmul.f32 %v2857_v58, %v2857_v58 }
 0x12c   :  { %v2844_v41 = vadd.f32 %v2332_v27, %v2655_v17  ;;  %v308_v13 = vpop.f32.mrf.mxu0 }
 0x12d   :  { %3532 = vst [vmem:[#allocation12_spill] sm:$0xff] %v2834_v28  ;;  %v2877_v23 = vadd.f32 %v2655_v17, %v308_v13 }
 0x12e   :  { %3534 = vst [vmem:[#allocation14_spill] sm:$0xff] %v2844_v41  ;;  %v568_v59 = vmul.f32 %v2844_v41, %v2844_v41 }
 0x12f   :  { %667 = vadd.xlane.f32.xlu1 %v560_v36  ;;  %665 = vadd.xlane.f32.xlu0 %v559_v37  ;;  %v565_v36 = vmul.f32 %v2827_v18, %v2827_v18  ;;  %v448_v37 = vpop.f32.mrf.mxu1  ;;  %3541 = vst [vmem:[#allocation21_spill] sm:$0xff] %v2877_v23  ;;  %v539_v51 = vmul.f32 %v2877_v23, %v2877_v23 }
 0x133   :  { %607 = vadd.xlane.f32.xlu1 %v530_v46  ;;  %605 = vadd.xlane.f32.xlu0 %v529_v47  ;;  %v2847_v46 = vadd.f32 %v2655_v17, %v448_v37  ;;  %v536_v47 = vmul.f32 %v2834_v28, %v2834_v28  ;;  %v2293_v37 = vpop.f32.mrf.mxu0 }
 0x135   :  { %3535 = vst [vmem:[#allocation15_spill] sm:$0xff] %v2847_v46 }
 0x137   :  { %671 = vadd.xlane.f32.xlu1 %v562_v54  ;;  %669 = vadd.xlane.f32.xlu0 %v561_v57  ;;  %v2335_v54 = vpop.f32.mrf.mxu1  ;;  %v2854_v57 = vadd.f32 %v2287_v40, %v2655_v17 }
 0x138   :  { %v2864_v5 = vadd.f32 %v2335_v54, %v2655_v17  ;;  %v318_v54 = vpop.f32.mrf.mxu0 }
 0x139   :  { %3536 = vst [vmem:[#allocation16_spill] sm:$0xff] %v2854_v57 }
 0x13a   :  { %3538 = vst [vmem:[#allocation18_spill] sm:$0xff] %v2864_v5  ;;  %v570_v27 = vmul.f32 %v2864_v5, %v2864_v5  ;;  %v2296_v13 = vpop.f32.mrf.mxu0 }
 0x13b   :  { %611 = vadd.xlane.f32.xlu1 %v532_v0  ;;  %609 = vadd.xlane.f32.xlu0 %v531_v1  ;;  %v567_v0 = vmul.f32 %v2847_v46, %v2847_v46  ;;  %v458_v1 = vpop.f32.mrf.mxu1 }
 0x13f   :  { %675 = vadd.xlane.f32.xlu1 %v564_v8  ;;  %673 = vadd.xlane.f32.xlu0 %v563_v11  ;;  %v2867_v8 = vadd.f32 %v2655_v17, %v458_v1  ;;  %v538_v11 = vmul.f32 %v2854_v57, %v2854_v57  ;;  %v2897_v1 = vadd.f32 %v2655_v17, %v318_v54 }
 0x141   :  { %3539 = vst [vmem:[#allocation19_spill] sm:$0xff] %v2867_v8  ;;  %3545 = vst [vmem:[#allocation25_spill] sm:$0xff] %v2897_v1 }
 0x143   :  { %615 = vadd.xlane.f32.xlu1 %v534_v19  ;;  %613 = vadd.xlane.f32.xlu0 %v533_v22  ;;  %v2338_v19 = vpop.f32.mrf.mxu1  ;;  %v2874_v22 = vadd.f32 %v2290_v2, %v2655_v17 }
 0x144   :  { %v2884_v40 = vadd.f32 %v2338_v19, %v2655_v17 }
 0x145   :  { %3540 = vst [vmem:[#allocation20_spill] sm:$0xff] %v2874_v22 }
 0x146   :  { %3542 = vst [vmem:[#allocation22_spill] sm:$0xff] %v2884_v40  ;;  %v572_v2 = vmul.f32 %v2884_v40, %v2884_v40 }
 0x147   :  { %679 = vadd.xlane.f32.xlu1 %v566_v33  ;;  %677 = vadd.xlane.f32.xlu0 %v565_v36  ;;  %v569_v33 = vmul.f32 %v2867_v8, %v2867_v8  ;;  %v468_v36 = vpop.f32.mrf.mxu1 }
 0x14b   :  { %619 = vadd.xlane.f32.xlu1 %v536_v47  ;;  %617 = vadd.xlane.f32.xlu0 %v535_v48  ;;  %v2887_v47 = vadd.f32 %v2655_v17, %v468_v36  ;;  %v540_v48 = vmul.f32 %v2874_v22, %v2874_v22  ;;  %v541_v36 = vmul.f32 %v2897_v1, %v2897_v1 }
 0x14d   :  { %3543 = vst [vmem:[#allocation23_spill] sm:$0xff] %v2887_v47 }
 0x14f   :  { %683 = vadd.xlane.f32.xlu1 %v568_v59  ;;  %681 = vadd.xlane.f32.xlu0 %v567_v0  ;;  %v2341_v59 = vpop.f32.mrf.mxu1  ;;  %v2894_v0 = vadd.f32 %v2293_v37, %v2655_v17  ;;  %v328_v37 = vpop.f32.mrf.mxu0 }
 0x150   :  { %v2904_v19 = vadd.f32 %v2341_v59, %v2655_v17  ;;  %v2917_v54 = vadd.f32 %v2655_v17, %v328_v37 }
 0x151   :  { %3544 = vst [vmem:[#allocation24_spill] sm:$0xff] %v2894_v0 }
 0x152   :  { %3546 = vst [vmem:[#allocation26_spill] sm:$0xff] %v2904_v19  ;;  %3549 = vst [vmem:[#allocation29_spill] sm:$0xff] %v2917_v54  ;;  %v574_v59 = vmul.f32 %v2904_v19, %v2904_v19 }
 0x153   :  { %623 = vadd.xlane.f32.xlu1 %v538_v11  ;;  %621 = vadd.xlane.f32.xlu0 %v537_v12  ;;  %v571_v11 = vmul.f32 %v2887_v47, %v2887_v47  ;;  %v478_v12 = vpop.f32.mrf.mxu1 }
 0x157   :  { %687 = vadd.xlane.f32.xlu1 %v570_v27  ;;  %685 = vadd.xlane.f32.xlu0 %v569_v33  ;;  %v2907_v27 = vadd.f32 %v2655_v17, %v478_v12  ;;  %v542_v33 = vmul.f32 %v2894_v0, %v2894_v0  ;;  %v2299_v12 = vpop.f32.mrf.mxu0 }
 0x159   :  { %3547 = vst [vmem:[#allocation27_spill] sm:$0xff] %v2907_v27  ;;  %v338_v37 = vpop.f32.mrf.mxu0 }
 0x15b   :  { %627 = vadd.xlane.f32.xlu1 %v540_v48  ;;  %625 = vadd.xlane.f32.xlu0 %v539_v51  ;;  %v2344_v48 = vpop.f32.mrf.mxu1  ;;  %v2914_v51 = vadd.f32 %v2296_v13, %v2655_v17 }
 0x15c   :  { %v2924_v1 = vadd.f32 %v2344_v48, %v2655_v17 }
 0x15d   :  { %3548 = vst [vmem:[#allocation28_spill] sm:$0xff] %v2914_v51  ;;  %v544_v13 = vmul.f32 %v2914_v51, %v2914_v51  ;;  %v2302_v51 = vpop.f32.mrf.mxu0 }
 0x15e   :  { %3550 = vst [vmem:[#allocation30_spill] sm:$0xff] %v2924_v1  ;;  %v576_v48 = vmul.f32 %v2924_v1, %v2924_v1 }
 0x15f   :  { %691 = vadd.xlane.f32.xlu1 %v572_v2  ;;  %689 = vadd.xlane.f32.xlu0 %v571_v11  ;;  %v573_v2 = vmul.f32 %v2907_v27, %v2907_v27  ;;  %v488_v11 = vpop.f32.mrf.mxu1  ;;  %v2934_v27 = vadd.f32 %v2299_v12, %v2655_v17 }
 0x161   :  { %v2347_v19 = vpop.f32.mrf.mxu1  ;;  %3552 = vst [vmem:[#allocation32_spill] sm:$0xff] %v2934_v27  ;;  %v546_v12 = vmul.f32 %v2934_v27, %v2934_v27 }
 0x163   :  { %631 = vadd.xlane.f32.xlu1 %v542_v33  ;;  %629 = vadd.xlane.f32.xlu0 %v541_v36  ;;  %v2927_v33 = vadd.f32 %v2655_v17, %v488_v11  ;;  %v543_v36 = vmul.f32 %v2917_v54, %v2917_v54  ;;  %v498_v11 = vpop.f32.mrf.mxu1  ;;  %v2944_v54 = vadd.f32 %v2347_v19, %v2655_v17 }
 0x165   :  { %3551 = vst [vmem:[#allocation31_spill] sm:$0xff] %v2927_v33  ;;  %3554 = vst [vmem:[#allocation34_spill] sm:$0xff] %v2944_v54  ;;  %v2350_v1 = vpop.f32.mrf.mxu1  ;;  %v578_v19 = vmul.f32 %v2944_v54, %v2944_v54 }
 0x167   :  { %695 = vadd.xlane.f32.xlu1 %v574_v59  ;;  %693 = vadd.xlane.f32.xlu0 %v573_v2  ;;  %v2937_v59 = vadd.f32 %v2655_v17, %v338_v37  ;;  %v575_v2 = vmul.f32 %v2927_v33, %v2927_v33  ;;  %v348_v37 = vpop.f32.mrf.mxu0  ;;  %v2954_v33 = vadd.f32 %v2302_v51, %v2655_v17 }
 0x169   :  { %3553 = vst [vmem:[#allocation33_spill] sm:$0xff] %v2937_v59  ;;  %3556 = vst [vmem:[#allocation36_spill] sm:$0xff] %v2954_v33  ;;  %v548_v51 = vmul.f32 %v2954_v33, %v2954_v33 }
 0x16b   :  { %635 = vadd.xlane.f32.xlu1 %v544_v13  ;;  %633 = vadd.xlane.f32.xlu0 %v543_v36  ;;  %v2947_v13 = vadd.f32 %v2655_v17, %v498_v11  ;;  %v545_v36 = vmul.f32 %v2937_v59, %v2937_v59  ;;  %v508_v11 = vpop.f32.mrf.mxu1  ;;  %v2964_v59 = vadd.f32 %v2350_v1, %v2655_v17 }
 0x16d   :  { %3555 = vst [vmem:[#allocation35_spill] sm:$0xff] %v2947_v13  ;;  %3558 = vst [vmem:[#allocation38_spill] sm:$0xff] %v2964_v59 }
 0x16f   :  { %699 = vadd.xlane.f32.xlu1 %v576_v48  ;;  %697 = vadd.xlane.f32.xlu0 %v575_v2  ;;  %v2957_v48 = vadd.f32 %v2655_v17, %v348_v37  ;;  %v577_v2 = vmul.f32 %v2947_v13, %v2947_v13  ;;  %v580_v37 = vmul.f32 %v2964_v59, %v2964_v59 }
 0x171   :  { %3557 = vst [vmem:[#allocation37_spill] sm:$0xff] %v2957_v48 }
 0x173   :  { %639 = vadd.xlane.f32.xlu1 %v546_v12  ;;  %637 = vadd.xlane.f32.xlu0 %v545_v36  ;;  %v2967_v12 = vadd.f32 %v2655_v17, %v508_v11  ;;  %v547_v36 = vmul.f32 %v2957_v48, %v2957_v48 }
 0x175   :  { %3559 = vst [vmem:[#allocation39_spill] sm:$0xff] %v2967_v12 }
 0x177   :  { %703 = vadd.xlane.f32.xlu1 %v578_v19  ;;  %701 = vadd.xlane.f32.xlu0 %v577_v2  ;;  %v579_v19 = vmul.f32 %v2967_v12, %v2967_v12 }
 0x17b   :  { %643 = vadd.xlane.f32.xlu1 %v548_v51  ;;  %641 = vadd.xlane.f32.xlu0 %v547_v36 }
 0x17f   :  { %707 = vadd.xlane.f32.xlu1 %v580_v37  ;;  %705 = vadd.xlane.f32.xlu0 %v579_v19 }
 0x18c   :  { %v648_v1 = vpop.xlane.xlu1 %647  ;;  %v584_v2 = vpop.xlane.xlu0 %583 }
 0x18d   :  { %v742_v17 = vmax.f32 %v648_v1, 1e-24  ;;  %v710_v11 = vmax.f32 %v584_v2, 1e-24 }
 0x18f   :  { %2391 = vrsqrt.f32 %v742_v17 }
 0x190   :  { %2393 = vrsqrt.f32 %v710_v11  ;;  %v588_v33 = vpop.xlane.xlu1 %587  ;;  %v582_v13 = vpop.xlane.xlu0 %581 }
 0x191   :  { %v712_v54 = vmax.f32 %v588_v33, 1e-24  ;;  %v709_v48 = vmax.f32 %v582_v13, 1e-24 }
 0x193   :  { %2395 = vrsqrt.f32 %v712_v54 }
 0x194   :  { %2397 = vrsqrt.f32 %v709_v48  ;;  %v652_v51 = vpop.xlane.xlu1 %651  ;;  %v2977_v36 = vpop.xlane.xlu0 %645 }
 0x195   :  { %v744_v59 = vmax.f32 %v652_v51, 1e-24  ;;  %v741_v12 = vmax.f32 %v2977_v36, 1e-24 }
 0x197   :  { %2399 = vrsqrt.f32 %v744_v59 }
 0x198   :  { %2401 = vrsqrt.f32 %v741_v12  ;;  %v2980_v37 = vpop.xlane.xlu1 %585  ;;  %v2982_v19 = vpop.xlane.xlu0 %649 }
 0x199   :  { %v711_v17 = vmax.f32 %v2980_v37, 1e-24  ;;  %v743_v11 = vmax.f32 %v2982_v19, 1e-24 }
 0x19b   :  { %2403 = vrsqrt.f32 %v711_v17 }
 0x19c   :  { %v2392_v27 = vpop.eup %2391  ;;  %2405 = vrsqrt.f32 %v743_v11  ;;  %v2986_v54 = vpop.xlane.xlu1 %591 }
 0x19d   :  { %v2988_v48 = vpop.xlane.xlu0 %589  ;;  %v2394_v0 = vpop.eup %2393  ;;  %v1318_v47 = vmul.f32 %v2392_v27, %v2392_v27  ;;  %v714_v59 = vmax.f32 %v2986_v54, 1e-24 }
 0x19e   :  { %v713_v12 = vmax.f32 %v2988_v48, 1e-24  ;;  %v1286_v40 = vmul.f32 %v2394_v0, %v2394_v0  ;;  %v838_v8 = vmul.f32 %v2394_v0, %v2658_v20 }
 0x19f   :  { %v1382_v23 = vmul.f32 %v1318_v47, %v648_v1  ;;  %2407 = vrsqrt.f32 %v714_v59  ;;  %v870_v1 = vmul.f32 %v2392_v27, %v2661_v21 }
 0x1a0   :  { %v2396_v22 = vpop.eup %2395  ;;  %v1350_v5 = vmul.f32 %v1286_v40, %v584_v2  ;;  %2409 = vrsqrt.f32 %v713_v12  ;;  %v2993_v17 = vpop.xlane.xlu1 %655 }
 0x1a1   :  { %v2995_v11 = vpop.xlane.xlu0 %653  ;;  %v2398_v58 = vpop.eup %2397  ;;  %v1641_v57 = vmul.f32 -2.0, %v1382_v23  ;;  %v1288_v46 = vmul.f32 %v2396_v22, %v2396_v22  ;;  %v746_v41 = vmax.f32 %v2993_v17, 1e-24  ;;  %v902_v23 = vmul.f32 2.0, %v838_v8 }
 0x1a2   :  { %v1609_v31 = vmul.f32 -2.0, %v1350_v5  ;;  %v837_v28 = vmul.f32 %v2398_v58, %v2664_v24  ;;  %v1285_v18 = vmul.f32 %v2398_v58, %v2398_v58  ;;  %v745_v47 = vmax.f32 %v2995_v11, 1e-24 }
 0x1a3   :  { %1770 = vst.msk [vmem:[%s3501_s4 + $0x108] sm:$0xff] %vm1736_vm0, %v1641_v57  ;;  %v1352_v20 = vmul.f32 %v1288_v46, %v588_v33  ;;  %2411 = vrsqrt.f32 %v746_v41  ;;  %v840_v59 = vmul.f32 %v2396_v22, %v2671_v29 }
 0x1a4   :  { %v2400_v40 = vpop.eup %2399  ;;  %1738 = vst.msk [vmem:[%s3501_s4 + $0x8] sm:$0xff] %vm1736_vm0, %v1609_v31  ;;  %v901_v24 = vmul.f32 2.0, %v837_v28  ;;  %v1349_v58 = vmul.f32 %v1285_v18, %v582_v13  ;;  %2413 = vrsqrt.f32 %v745_v47  ;;  %v3009_v5 = vpop.xlane.xlu1 %595  ;;  %v934_v13 = vmul.f32 2.0, %v870_v1 }
 0x1a5   :  { %v3011_v21 = vpop.xlane.xlu0 %593  ;;  %v2402_v0 = vpop.eup %2401  ;;  %v1611_v27 = vmul.f32 -2.0, %v1352_v20  ;;  %v1320_v2 = vmul.f32 %v2400_v40, %v2400_v40  ;;  %v716_v46 = vmax.f32 %v3009_v5, 1e-24 }
 0x1a6   :  { %v1955_v41 = vpack.c.bf16 %v902_v23, %v901_v24  ;;  %v1608_v57 = vmul.f32 -2.0, %v1349_v58  ;;  %v869_v8 = vmul.f32 %v2402_v0, %v2677_v32  ;;  %v1317_v33 = vmul.f32 %v2402_v0, %v2402_v0 }
 0x1a7   :  { %1740 = vst.msk [vmem:[%s3501_s4 + $0x18] sm:$0xff] %vm1736_vm0, %v1611_v27  ;;  %v1384_v18 = vmul.f32 %v1320_v2, %v652_v51  ;;  %2415 = vrsqrt.f32 %v716_v46  ;;  %v715_v28 = vmax.f32 %v3011_v21, 1e-24  ;;  %v872_v32 = vmul.f32 %v2400_v40, %v2674_v30 }
 0x1a8   :  { %v2404_v31 = vpop.eup %2403  ;;  %1956 = vst [vmem:[#allocation7] sm:$0xff] %v1955_v41   ;;  %1737 = vst.msk [vmem:[%s3501_s4] sm:$0xff] %vm1736_vm0, %v1608_v57  ;;  %v933_v29 = vmul.f32 2.0, %v869_v8  ;;  %v1381_v22 = vmul.f32 %v1317_v33, %v2977_v36  ;;  %v3027_v12 = vpop.xlane.xlu1 %659  ;;  %v904_v2 = vmul.f32 2.0, %v840_v59 }
 0x1a9   :  { %v3029_v47 = vpop.xlane.xlu0 %657  ;;  %v2406_v51 = vpop.eup %2405  ;;  %v1643_v20 = vmul.f32 -2.0, %v1384_v18  ;;  %v839_v23 = vmul.f32 %v2404_v31, %v2686_v38  ;;  %v1287_v1 = vmul.f32 %v2404_v31, %v2404_v31  ;;  %2417 = vrsqrt.f32 %v715_v28 }
 0x1aa   :  { %v2035_v24 = vpack.c.bf16 %v934_v13, %v933_v29  ;;  %v1640_v58 = vmul.f32 -2.0, %v1381_v22  ;;  %v871_v0 = vmul.f32 %v2406_v51, %v2689_v39  ;;  %v1319_v27 = vmul.f32 %v2406_v51, %v2406_v51 }
 0x1ab   :  { %1772 = vst.msk [vmem:[%s3501_s4 + $0x118] sm:$0xff] %vm1736_vm0, %v1643_v20  ;;  %v903_v30 = vmul.f32 2.0, %v839_v23  ;;  %v1351_v36 = vmul.f32 %v1287_v1, %v2980_v37  ;;  %v748_v40 = vmax.f32 %v3027_v12, 1e-24  ;;  %v936_v38 = vmul.f32 2.0, %v872_v32 }
 0x1ac   :  { %v2408_v46 = vpop.eup %2407  ;;  %2127 = vst [vmem:[#allocation7 + $0x80] sm:$0xff] %v2035_v24   ;;  %1769 = vst.msk [vmem:[%s3501_s4 + $0x100] sm:$0xff] %vm1736_vm0, %v1640_v58  ;;  %v935_v39 = vmul.f32 2.0, %v871_v0  ;;  %v1383_v41 = vmul.f32 %v1319_v27, %v2982_v19  ;;  %v747_v57 = vmax.f32 %v3029_v47, 1e-24  ;;  %v3045_v8 = vpop.xlane.xlu1 %599 }
 0x1ad   :  { %v3047_v33 = vpop.xlane.xlu0 %597  ;;  %v2410_v37 = vpop.eup %2409  ;;  %v1960_v59 = vpack.c.bf16 %v904_v2, %v903_v30  ;;  %v1610_v18 = vmul.f32 -2.0, %v1351_v36  ;;  %v842_v28 = vmul.f32 %v2408_v46, %v2694_v43  ;;  %v1290_v31 = vmul.f32 %v2408_v46, %v2408_v46 }
 0x1ae   :  { %v2040_v13 = vpack.c.bf16 %v936_v38, %v935_v39  ;;  %v1642_v32 = vmul.f32 -2.0, %v1383_v41  ;;  %v841_v29 = vmul.f32 %v2410_v37, %v2697_v44  ;;  %v1289_v22 = vmul.f32 %v2410_v37, %v2410_v37 }
 0x1af   :  { %2112 = vst [vmem:[#allocation7 + $0x8] sm:$0xff] %v1960_v59   ;;  %1739 = vst.msk [vmem:[%s3501_s4 + $0x10] sm:$0xff] %vm1736_vm0, %v1610_v18  ;;  %v906_v19 = vmul.f32 2.0, %v842_v28  ;;  %v1354_v51 = vmul.f32 %v1290_v31, %v2986_v54  ;;  %2419 = vrsqrt.f32 %v748_v40  ;;  %v718_v20 = vmax.f32 %v3045_v8, 1e-24 }
 0x1b0   :  { %v2412_v23 = vpop.eup %2411  ;;  %2128 = vst [vmem:[#allocation7 + $0x88] sm:$0xff] %v2040_v13   ;;  %1771 = vst.msk [vmem:[%s3501_s4 + $0x110] sm:$0xff] %vm1736_vm0, %v1642_v32  ;;  %v905_v43 = vmul.f32 2.0, %v841_v29  ;;  %v1353_v44 = vmul.f32 %v1289_v22, %v2988_v48  ;;  %2421 = vrsqrt.f32 %v747_v57  ;;  %v717_v1 = vmax.f32 %v3047_v33, 1e-24  ;;  %v3063_v24 = vpop.xlane.xlu1 %663 }
 0x1b1   :  { %v3065_v58 = vpop.xlane.xlu0 %661  ;;  %v2414_v54 = vpop.eup %2413  ;;  %v1613_v0 = vmul.f32 -2.0, %v1354_v51  ;;  %v874_v27 = vmul.f32 %v2412_v23, %v2704_v49  ;;  %v1322_v2 = vmul.f32 %v2412_v23, %v2412_v23  ;;  %2423 = vrsqrt.f32 %v718_v20 }
 0x1b2   :  { %v1965_v30 = vpack.c.bf16 %v906_v19, %v905_v43  ;;  %v1612_v36 = vmul.f32 -2.0, %v1353_v44  ;;  %v873_v40 = vmul.f32 %v2414_v54, %v2707_v50  ;;  %v1321_v46 = vmul.f32 %v2414_v54, %v2414_v54 }
 0x1b3   :  { %1742 = vst.msk [vmem:[%s3501_s4 + $0x28] sm:$0xff] %vm1736_vm0, %v1613_v0  ;;  %v938_v48 = vmul.f32 2.0, %v874_v27  ;;  %v1386_v38 = vmul.f32 %v1322_v2, %v2993_v17  ;;  %2425 = vrsqrt.f32 %v717_v1  ;;  %v750_v39 = vmax.f32 %v3063_v24, 1e-24 }
 0x1b4   :  { %v2416_v41 = vpop.eup %2415  ;;  %2113 = vst [vmem:[#allocation7 + $0x10] sm:$0xff] %v1965_v30   ;;  %1741 = vst.msk [vmem:[%s3501_s4 + $0x20] sm:$0xff] %vm1736_vm0, %v1612_v36  ;;  %v937_v49 = vmul.f32 2.0, %v873_v40  ;;  %v1385_v50 = vmul.f32 %v1321_v46, %v2995_v11  ;;  %v749_v57 = vmax.f32 %v3065_v58, 1e-24  ;;  %v3081_v37 = vpop.xlane.xlu1 %603 }
 0x1b5   :  { %v3083_v59 = vpop.xlane.xlu0 %601  ;;  %v1645_v17 = vmul.f32 -2.0, %v1386_v38  ;;  %v844_v18 = vmul.f32 %v2416_v41, %v2714_v55  ;;  %v1292_v28 = vmul.f32 %v2416_v41, %v2416_v41  ;;  %2427 = vrsqrt.f32 %v750_v39 }
 0x1b6   :  { %v2418_v31 = vpop.eup %2417  ;;  %v2045_v13 = vpack.c.bf16 %v938_v48, %v937_v49  ;;  %v1644_v32 = vmul.f32 -2.0, %v1385_v50  ;;  %2429 = vrsqrt.f32 %v749_v57  ;;  %v720_v29 = vmax.f32 %v3081_v37, 1e-24 }
 0x1b7   :  { %1774 = vst.msk [vmem:[%s3501_s4 + $0x128] sm:$0xff] %vm1736_vm0, %v1645_v17  ;;  %v908_v11 = vmul.f32 2.0, %v844_v18  ;;  %v1356_v22 = vmul.f32 %v1292_v28, %v3009_v5  ;;  %v843_v19 = vmul.f32 %v2418_v31, %v2717_v56  ;;  %v1291_v51 = vmul.f32 %v2418_v31, %v2418_v31 }
 0x1b8   :  { %2129 = vst [vmem:[#allocation7 + $0x90] sm:$0xff] %v2045_v13   ;;  %1773 = vst.msk [vmem:[%s3501_s4 + $0x120] sm:$0xff] %vm1736_vm0, %v1644_v32  ;;  %2431 = vrsqrt.f32 %v720_v29  ;;  %v719_v55 = vmax.f32 %v3083_v59, 1e-24  ;;  %v3098_v20 = vpop.xlane.xlu1 %667 }
 0x1b9   :  { %v3100_v23 = vpop.xlane.xlu0 %665  ;;  %v1615_v43 = vmul.f32 -2.0, %v1356_v22  ;;  %v907_v44 = vmul.f32 2.0, %v843_v19  ;;  %v1355_v5 = vmul.f32 %v1291_v51, %v3011_v21  ;;  %v752_v56 = vmax.f32 %v3098_v20, 1e-24 }
 0x1ba   :  { %2433 = vrsqrt.f32 %v719_v55  ;;  %v751_v1 = vmax.f32 %v3100_v23, 1e-24 }
 0x1bb   :  { %1744 = vst.msk [vmem:[%s3501_s4 + $0x38] sm:$0xff] %vm1736_vm0, %v1615_v43  ;;  %v1970_v54 = vpack.c.bf16 %v908_v11, %v907_v44  ;;  %v1614_v0 = vmul.f32 -2.0, %v1355_v5  ;;  %2435 = vrsqrt.f32 %v752_v56 }
 0x1bc   :  { %v2420_v27 = vpop.eup %2419  ;;  %2437 = vrsqrt.f32 %v751_v1  ;;  %v3109_v2 = vpop.xlane.xlu1 %607 }
 0x1bd   :  { %v3111_v30 = vpop.xlane.xlu0 %605  ;;  %v2422_v21 = vpop.eup %2421  ;;  %2114 = vst [vmem:[#allocation7 + $0x18] sm:$0xff] %v1970_v54   ;;  %1743 = vst.msk [vmem:[%s3501_s4 + $0x30] sm:$0xff] %vm1736_vm0, %v1614_v0  ;;  %v876_v36 = vmul.f32 %v2420_v27, %v2724_v61  ;;  %v1324_v40 = vmul.f32 %v2420_v27, %v2420_v27  ;;  %v722_v46 = vmax.f32 %v3109_v2, 1e-24 }
 0x1be   :  { %v2424_v48 = vpop.eup %2423  ;;  %v875_v38 = vmul.f32 %v2422_v21, %v2727_v62  ;;  %v1323_v39 = vmul.f32 %v2422_v21, %v2422_v21  ;;  %v721_v41 = vmax.f32 %v3111_v30, 1e-24 }
 0x1bf   :  { %v940_v49 = vmul.f32 2.0, %v876_v36  ;;  %v1388_v50 = vmul.f32 %v1324_v40, %v3027_v12  ;;  %v846_v57 = vmul.f32 %v2424_v48, %v2734_v3  ;;  %v1294_v17 = vmul.f32 %v2424_v48, %v2424_v48 }
 0x1c0   :  { %v2426_v18 = vpop.eup %2425  ;;  %v939_v28 = vmul.f32 2.0, %v875_v38  ;;  %v1387_v31 = vmul.f32 %v1323_v39, %v3029_v47  ;;  %2439 = vrsqrt.f32 %v722_v46  ;;  %v3124_v61 = vpop.xlane.xlu1 %671 }
 0x1c1   :  { %v3126_v13 = vpop.xlane.xlu0 %669  ;;  %v1647_v32 = vmul.f32 -2.0, %v1388_v50  ;;  %v910_v62 = vmul.f32 2.0, %v846_v57  ;;  %v1358_v29 = vmul.f32 %v1294_v17, %v3045_v8  ;;  %v845_v11 = vmul.f32 %v2426_v18, %v2737_v4 }
 0x1c2   :  { %v2428_v22 = vpop.eup %2427  ;;  %v2050_v12 = vpack.c.bf16 %v940_v49, %v939_v28  ;;  %v1646_v19 = vmul.f32 -2.0, %v1387_v31  ;;  %v1293_v3 = vmul.f32 %v2426_v18, %v2426_v18  ;;  %2441 = vrsqrt.f32 %v721_v41 }
 0x1c3   :  { %v2430_v51 = vpop.eup %2429  ;;  %1776 = vst.msk [vmem:[%s3501_s4 + $0x138] sm:$0xff] %vm1736_vm0, %v1647_v32  ;;  %v1617_v47 = vmul.f32 -2.0, %v1358_v29  ;;  %v909_v55 = vmul.f32 2.0, %v845_v11  ;;  %v878_v43 = vmul.f32 %v2428_v22, %v2744_v9  ;;  %v1326_v44 = vmul.f32 %v2428_v22, %v2428_v22 }
 0x1c4   :  { %2130 = vst [vmem:[#allocation7 + $0x98] sm:$0xff] %v2050_v12   ;;  %1775 = vst.msk [vmem:[%s3501_s4 + $0x130] sm:$0xff] %vm1736_vm0, %v1646_v19  ;;  %v1357_v4 = vmul.f32 %v1293_v3, %v3047_v33  ;;  %v877_v8 = vmul.f32 %v2430_v51, %v2747_v10  ;;  %v1325_v5 = vmul.f32 %v2430_v51, %v2430_v51  ;;  %v754_v56 = vmax.f32 %v3124_v61, 1e-24  ;;  %v3142_v1 = vpop.xlane.xlu1 %611 }
 0x1c5   :  { %v3144_v54 = vpop.xlane.xlu0 %609  ;;  %v2432_v0 = vpop.eup %2431  ;;  %1746 = vst.msk [vmem:[%s3501_s4 + $0x48] sm:$0xff] %vm1736_vm0, %v1617_v47  ;;  %v1975_v9 = vpack.c.bf16 %v910_v62, %v909_v55  ;;  %v942_v27 = vmul.f32 2.0, %v878_v43  ;;  %v1390_v21 = vmul.f32 %v1326_v44, %v3063_v24  ;;  %v753_v33 = vmax.f32 %v3126_v13, 1e-24 }
 0x1c6   :  { %v1616_v10 = vmul.f32 -2.0, %v1357_v4  ;;  %v941_v36 = vmul.f32 2.0, %v877_v8  ;;  %v1389_v40 = vmul.f32 %v1325_v5, %v3065_v58  ;;  %v848_v46 = vmul.f32 %v2432_v0, %v2754_v15 }
 0x1c7   :  { %v2434_v48 = vpop.eup %2433  ;;  %2115 = vst [vmem:[#allocation7 + $0x20] sm:$0xff] %v1975_v9   ;;  %v1649_v38 = vmul.f32 -2.0, %v1390_v21  ;;  %v1296_v39 = vmul.f32 %v2432_v0, %v2432_v0  ;;  %2443 = vrsqrt.f32 %v754_v56  ;;  %v724_v41 = vmax.f32 %v3142_v1, 1e-24 }
 0x1c8   :  { %v2436_v49 = vpop.eup %2435  ;;  %1745 = vst.msk [vmem:[%s3501_s4 + $0x40] sm:$0xff] %vm1736_vm0, %v1616_v10  ;;  %v2055_v24 = vpack.c.bf16 %v942_v27, %v941_v36  ;;  %v1648_v50 = vmul.f32 -2.0, %v1389_v40  ;;  %v912_v57 = vmul.f32 2.0, %v848_v46  ;;  %v847_v58 = vmul.f32 %v2434_v48, %v2757_v16  ;;  %v3160_v17 = vpop.xlane.xlu1 %675 }
 0x1c9   :  { %v3162_v15 = vpop.xlane.xlu0 %673  ;;  %v2438_v18 = vpop.eup %2437  ;;  %1778 = vst.msk [vmem:[%s3501_s4 + $0x148] sm:$0xff] %vm1736_vm0, %v1649_v38  ;;  %v1360_v28 = vmul.f32 %v1296_v39, %v3081_v37  ;;  %v1295_v31 = vmul.f32 %v2434_v48, %v2434_v48  ;;  %v880_v32 = vmul.f32 %v2436_v49, %v2764_v25  ;;  %v1328_v62 = vmul.f32 %v2436_v49, %v2436_v49 }
 0x1ca   :  { %2131 = vst [vmem:[#allocation7 + $0xa0] sm:$0xff] %v2055_v24   ;;  %1777 = vst.msk [vmem:[%s3501_s4 + $0x140] sm:$0xff] %vm1736_vm0, %v1648_v50  ;;  %v911_v16 = vmul.f32 2.0, %v847_v58  ;;  %v879_v29 = vmul.f32 %v2438_v18, %v2767_v26  ;;  %v1327_v11 = vmul.f32 %v2438_v18, %v2438_v18  ;;  %2445 = vrsqrt.f32 %v753_v33 }
 0x1cb   :  { %v1619_v22 = vmul.f32 -2.0, %v1360_v28  ;;  %v1359_v12 = vmul.f32 %v1295_v31, %v3083_v59  ;;  %v944_v19 = vmul.f32 2.0, %v880_v32  ;;  %v1392_v37 = vmul.f32 %v1328_v62, %v3098_v20 }
 0x1cc   :  { %v1980_v3 = vpack.c.bf16 %v912_v57, %v911_v16  ;;  %v943_v25 = vmul.f32 2.0, %v879_v29  ;;  %v1391_v51 = vmul.f32 %v1327_v11, %v3100_v23  ;;  %2447 = vrsqrt.f32 %v724_v41  ;;  %v3178_v47 = vpop.xlane.xlu1 %615 }
 0x1cd   :  { %v3180_v55 = vpop.xlane.xlu0 %613  ;;  %v2440_v43 = vpop.eup %2439  ;;  %1748 = vst.msk [vmem:[%s3501_s4 + $0x58] sm:$0xff] %vm1736_vm0, %v1619_v22  ;;  %v1618_v26 = vmul.f32 -2.0, %v1359_v12  ;;  %v1651_v59 = vmul.f32 -2.0, %v1392_v37  ;;  %v723_v44 = vmax.f32 %v3144_v54, 1e-24 }
 0x1ce   :  { %v756_v20 = vmax.f32 %v3160_v17, 1e-24  ;;  %2116 = vst [vmem:[#allocation7 + $0x28] sm:$0xff] %v1980_v3   ;;  %v2060_v4 = vpack.c.bf16 %v944_v19, %v943_v25  ;;  %v1650_v23 = vmul.f32 -2.0, %v1391_v51  ;;  %v850_v8 = vmul.f32 %v2440_v43, %v2774_v34 }
 0x1cf   :  { %v1298_v5 = vmul.f32 %v2440_v43, %v2440_v43  ;;  %v2442_v56 = vpop.eup %2441  ;;  %1747 = vst.msk [vmem:[%s3501_s4 + $0x50] sm:$0xff] %vm1736_vm0, %v1618_v26  ;;  %1780 = vst.msk [vmem:[%s3501_s4 + $0x158] sm:$0xff] %vm1736_vm0, %v1651_v59  ;;  %2449 = vrsqrt.f32 %v723_v44  ;;  %v755_v0 = vmax.f32 %v3162_v15, 1e-24  ;;  %v726_v9 = vmax.f32 %v3178_v47, 1e-24 }
 0x1d0   :  { %v725_v27 = vmax.f32 %v3180_v55, 1e-24  ;;  %2132 = vst [vmem:[#allocation7 + $0xa8] sm:$0xff] %v2060_v4   ;;  %1779 = vst.msk [vmem:[%s3501_s4 + $0x150] sm:$0xff] %vm1736_vm0, %v1650_v23  ;;  %v914_v34 = vmul.f32 2.0, %v850_v8  ;;  %v849_v33 = vmul.f32 %v2442_v56, %v2777_v35  ;;  %v1297_v10 = vmul.f32 %v2442_v56, %v2442_v56  ;;  %v3206_v36 = vpop.xlane.xlu1 %679 }
 0x1d1   :  { %v1362_v21 = vmul.f32 %v1298_v5, %v3109_v2  ;;  %v3208_v40 = vpop.xlane.xlu0 %677  ;;  %2451 = vrsqrt.f32 %v756_v20  ;;  %v758_v46 = vmax.f32 %v3206_v36, 1e-24 }
 0x1d2   :  { %v757_v48 = vmax.f32 %v3208_v40, 1e-24  ;;  %v913_v39 = vmul.f32 2.0, %v849_v33  ;;  %v1361_v41 = vmul.f32 %v1297_v10, %v3111_v30  ;;  %2453 = vrsqrt.f32 %v755_v0 }
 0x1d3   :  { %v1621_v38 = vmul.f32 -2.0, %v1362_v21  ;;  %2455 = vrsqrt.f32 %v726_v9 }
 0x1d4   :  { %v2444_v49 = vpop.eup %2443  ;;  %v1985_v35 = vpack.c.bf16 %v914_v34, %v913_v39  ;;  %v1620_v2 = vmul.f32 -2.0, %v1361_v41  ;;  %2457 = vrsqrt.f32 %v725_v27  ;;  %v3217_v24 = vpop.xlane.xlu1 %619 }
 0x1d5   :  { %1750 = vst.msk [vmem:[%s3501_s4 + $0x68] sm:$0xff] %vm1736_vm0, %v1621_v38  ;;  %v3219_v50 = vpop.xlane.xlu0 %617  ;;  %v882_v57 = vmul.f32 %v2444_v49, %v2784_v42  ;;  %v1330_v58 = vmul.f32 %v2444_v49, %v2444_v49  ;;  %2459 = vrsqrt.f32 %v758_v46  ;;  %v728_v30 = vmax.f32 %v3217_v24, 1e-24 }
 0x1d6   :  { %2117 = vst [vmem:[#allocation7 + $0x30] sm:$0xff] %v1985_v35   ;;  %1749 = vst.msk [vmem:[%s3501_s4 + $0x60] sm:$0xff] %vm1736_vm0, %v1620_v2  ;;  %2461 = vrsqrt.f32 %v757_v48  ;;  %v727_v18 = vmax.f32 %v3219_v50, 1e-24 }
 0x1d7   :  { %v2446_v28 = vpop.eup %2445  ;;  %v1394_v31 = vmul.f32 %v1330_v58, %v3124_v61  ;;  %2463 = vrsqrt.f32 %v728_v30  ;;  %v946_v32 = vmul.f32 2.0, %v882_v57 }
 0x1d8   :  { %v881_v42 = vmul.f32 %v2446_v28, %v2787_v45  ;;  %v1329_v62 = vmul.f32 %v2446_v28, %v2446_v28  ;;  %2465 = vrsqrt.f32 %v727_v18  ;;  %v3230_v16 = vpop.xlane.xlu1 %683 }
 0x1d9   :  { %v3232_v29 = vpop.xlane.xlu0 %681  ;;  %v2448_v11 = vpop.eup %2447  ;;  %v1653_v22 = vmul.f32 -2.0, %v1394_v31  ;;  %v760_v12 = vmax.f32 %v3230_v16, 1e-24 }
 0x1da   :  { %v759_v19 = vmax.f32 %v3232_v29, 1e-24  ;;  %v945_v37 = vmul.f32 2.0, %v881_v42  ;;  %v1393_v3 = vmul.f32 %v1329_v62, %v3126_v13  ;;  %v852_v61 = vmul.f32 %v2448_v11, %v2794_v52 }
 0x1db   :  { %v1300_v25 = vmul.f32 %v2448_v11, %v2448_v11  ;;  %1782 = vst.msk [vmem:[%s3501_s4 + $0x168] sm:$0xff] %vm1736_vm0, %v1653_v22  ;;  %2467 = vrsqrt.f32 %v760_v12  ;;  %v3560_v12 = vld [vmem:[#allocation11_spill] sm:$0xff] }
 0x1dc   :  { %v2450_v45 = vpop.eup %2449  ;;  %v2065_v51 = vpack.c.bf16 %v946_v32, %v945_v37  ;;  %v1652_v43 = vmul.f32 -2.0, %v1393_v3  ;;  %v916_v26 = vmul.f32 2.0, %v852_v61  ;;  %v3243_v44 = vpop.xlane.xlu1 %623  ;;  %2469 = vrsqrt.f32 %v759_v19  ;;  %v3561_v3 = vld [vmem:[#allocation12_spill] sm:$0xff] }
 0x1dd   :  { %v1364_v59 = vmul.f32 %v1300_v25, %v3142_v1  ;;  %v3245_v20 = vpop.xlane.xlu0 %621  ;;  %v851_v13 = vmul.f32 %v2450_v45, %v2797_v53  ;;  %v1299_v52 = vmul.f32 %v2450_v45, %v2450_v45  ;;  %v730_v4 = vmax.f32 %v3243_v44, 1e-24 }
 0x1de   :  { %v2452_v23 = vpop.eup %2451  ;;  %2133 = vst [vmem:[#allocation7 + $0xb0] sm:$0xff] %v2065_v51   ;;  %1781 = vst.msk [vmem:[%s3501_s4 + $0x160] sm:$0xff] %vm1736_vm0, %v1652_v43  ;;  %v729_v21 = vmax.f32 %v3245_v20, 1e-24 }
 0x1df   :  { %v1623_v8 = vmul.f32 -2.0, %v1364_v59  ;;  %v2454_v5 = vpop.eup %2453  ;;  %v915_v1 = vmul.f32 2.0, %v851_v13  ;;  %v1363_v56 = vmul.f32 %v1299_v52, %v3144_v54  ;;  %v884_v0 = vmul.f32 %v2452_v23, %v2804_v60  ;;  %v3562_v52 = vld [vmem:[#allocation13_spill] sm:$0xff] }
 0x1e0   :  { %v1332_v9 = vmul.f32 %v2452_v23, %v2452_v23  ;;  %v2456_v53 = vpop.eup %2455  ;;  %v883_v27 = vmul.f32 %v2454_v5, %v2807_v63  ;;  %v1331_v34 = vmul.f32 %v2454_v5, %v2454_v5  ;;  %2471 = vrsqrt.f32 %v730_v4  ;;  %v3261_v33 = vpop.xlane.xlu1 %687 }
 0x1e1   :  { %1752 = vst.msk [vmem:[%s3501_s4 + $0x78] sm:$0xff] %vm1736_vm0, %v1623_v8  ;;  %v3263_v10 = vpop.xlane.xlu0 %685  ;;  %v2458_v54 = vpop.eup %2457  ;;  %v1990_v46 = vpack.c.bf16 %v916_v26, %v915_v1  ;;  %v1622_v60 = vmul.f32 -2.0, %v1363_v56  ;;  %v948_v48 = vmul.f32 2.0, %v884_v0  ;;  %v854_v63 = vmul.f32 %v2456_v53, %v2814_v6  ;;  %v3563_v56 = vld [vmem:[#allocation14_spill] sm:$0xff] }
 0x1e2   :  { %v1396_v38 = vmul.f32 %v1332_v9, %v3160_v17  ;;  %v2460_v39 = vpop.eup %2459  ;;  %v947_v41 = vmul.f32 2.0, %v883_v27  ;;  %v1395_v49 = vmul.f32 %v1331_v34, %v3162_v15  ;;  %v1302_v35 = vmul.f32 %v2456_v53, %v2456_v53 }
 0x1e3   :  { %v2462_v2 = vpop.eup %2461  ;;  %2118 = vst [vmem:[#allocation7 + $0x38] sm:$0xff] %v1990_v46   ;;  %1751 = vst.msk [vmem:[%s3501_s4 + $0x70] sm:$0xff] %vm1736_vm0, %v1622_v60  ;;  %v853_v58 = vmul.f32 %v2458_v54, %v2817_v7  ;;  %v1301_v30 = vmul.f32 %v2458_v54, %v2458_v54  ;;  %v886_v17 = vmul.f32 %v2460_v39, %v2824_v14  ;;  %v918_v15 = vmul.f32 2.0, %v854_v63 }
 0x1e4   :  { %v1655_v57 = vmul.f32 -2.0, %v1396_v38  ;;  %v2464_v18 = vpop.eup %2463  ;;  %v2070_v28 = vpack.c.bf16 %v948_v48, %v947_v41  ;;  %v1654_v31 = vmul.f32 -2.0, %v1395_v49  ;;  %v1366_v6 = vmul.f32 %v1302_v35, %v3178_v47  ;;  %v3275_v32 = vpop.xlane.xlu1 %627  ;;  %v3564_v48 = vld [vmem:[#allocation15_spill] sm:$0xff] }
 0x1e5   :  { %v3277_v42 = vpop.xlane.xlu0 %625  ;;  %v2466_v62 = vpop.eup %2465  ;;  %v917_v7 = vmul.f32 2.0, %v853_v58  ;;  %v1365_v11 = vmul.f32 %v1301_v30, %v3180_v55  ;;  %v950_v14 = vmul.f32 2.0, %v886_v17  ;;  %v1334_v22 = vmul.f32 %v2460_v39, %v2460_v39 }
 0x1e6   :  { %1784 = vst.msk [vmem:[%s3501_s4 + $0x178] sm:$0xff] %vm1736_vm0, %v1655_v57  ;;  %2134 = vst [vmem:[#allocation7 + $0xb8] sm:$0xff] %v2070_v28   ;;  %v1625_v47 = vmul.f32 -2.0, %v1366_v6  ;;  %v885_v19 = vmul.f32 %v2462_v2, %v3560_v12  ;;  %v1333_v37 = vmul.f32 %v2462_v2, %v2462_v2  ;;  %v856_v61 = vmul.f32 %v2464_v18, %v3561_v3 }
 0x1e7   :  { %1783 = vst.msk [vmem:[%s3501_s4 + $0x170] sm:$0xff] %vm1736_vm0, %v1654_v31  ;;  %v1995_v25 = vpack.c.bf16 %v918_v15, %v917_v7  ;;  %v1624_v45 = vmul.f32 -2.0, %v1365_v11  ;;  %v1398_v51 = vmul.f32 %v1334_v22, %v3206_v36  ;;  %v1304_v43 = vmul.f32 %v2464_v18, %v2464_v18 }
 0x1e8   :  { %v2468_v55 = vpop.eup %2467  ;;  %1754 = vst.msk [vmem:[%s3501_s4 + $0x88] sm:$0xff] %vm1736_vm0, %v1625_v47  ;;  %v949_v26 = vmul.f32 2.0, %v885_v19  ;;  %v1397_v59 = vmul.f32 %v1333_v37, %v3208_v40  ;;  %v920_v13 = vmul.f32 2.0, %v856_v61  ;;  %v855_v4 = vmul.f32 %v2466_v62, %v3562_v52  ;;  %v3297_v23 = vpop.xlane.xlu1 %691  ;;  %v3565_v61 = vld [vmem:[#allocation16_spill] sm:$0xff] }
 0x1e9   :  { %v3299_v8 = vpop.xlane.xlu0 %689  ;;  %2119 = vst [vmem:[#allocation7 + $0x40] sm:$0xff] %v1995_v25   ;;  %1753 = vst.msk [vmem:[%s3501_s4 + $0x80] sm:$0xff] %vm1736_vm0, %v1624_v45  ;;  %v1657_v36 = vmul.f32 -2.0, %v1398_v51  ;;  %v1368_v5 = vmul.f32 %v1304_v43, %v3217_v24  ;;  %v1303_v1 = vmul.f32 %v2466_v62, %v2466_v62  ;;  %v888_v0 = vmul.f32 %v2468_v55, %v3563_v56  ;;  %v2470_v40 = vpop.eup %2469 }
 0x1ea   :  { %v2075_v9 = vpack.c.bf16 %v950_v14, %v949_v26  ;;  %v1656_v53 = vmul.f32 -2.0, %v1397_v59  ;;  %v919_v27 = vmul.f32 2.0, %v855_v4  ;;  %v1336_v34 = vmul.f32 %v2468_v55, %v2468_v55  ;;  %v3566_v4 = vld [vmem:[#allocation17_spill] sm:$0xff] }
 0x1eb   :  { %1786 = vst.msk [vmem:[%s3501_s4 + $0x188] sm:$0xff] %vm1736_vm0, %v1657_v36  ;;  %v1627_v54 = vmul.f32 -2.0, %v1368_v5  ;;  %v1367_v46 = vmul.f32 %v1303_v1, %v3219_v50  ;;  %v952_v60 = vmul.f32 2.0, %v888_v0  ;;  %v887_v38 = vmul.f32 %v2470_v40, %v3564_v48 }
 0x1ec   :  { %2135 = vst [vmem:[#allocation7 + $0xc0] sm:$0xff] %v2075_v9   ;;  %1785 = vst.msk [vmem:[%s3501_s4 + $0x180] sm:$0xff] %vm1736_vm0, %v1656_v53  ;;  %v2000_v24 = vpack.c.bf16 %v920_v13, %v919_v27  ;;  %v1400_v39 = vmul.f32 %v1336_v34, %v3230_v16  ;;  %v1335_v41 = vmul.f32 %v2470_v40, %v2470_v40  ;;  %2473 = vrsqrt.f32 %v729_v21  ;;  %v3320_v49 = vpop.xlane.xlu1 %631  ;;  %v3567_v34 = vld [vmem:[#allocation18_spill] sm:$0xff] }
 0x1ed   :  { %v3322_v63 = vpop.xlane.xlu0 %629  ;;  %v2472_v50 = vpop.eup %2471  ;;  %1756 = vst.msk [vmem:[%s3501_s4 + $0x98] sm:$0xff] %vm1736_vm0, %v1627_v54  ;;  %v1626_v35 = vmul.f32 -2.0, %v1367_v46  ;;  %v951_v2 = vmul.f32 2.0, %v887_v38  ;;  %v762_v57 = vmax.f32 %v3261_v33, 1e-24  ;;  %v1414_v47 = vlaneseq }
 0x1ee   :  { %v761_v16 = vmax.f32 %v3263_v10, 1e-24  ;;  %2120 = vst [vmem:[#allocation7 + $0x48] sm:$0xff] %v2000_v24   ;;  %v1659_v58 = vmul.f32 -2.0, %v1400_v39  ;;  %v1399_v21 = vmul.f32 %v1335_v41, %v3232_v29  ;;  %v1306_v30 = vmul.f32 %v2472_v50, %v2472_v50  ;;  %v3568_v41 = vld [vmem:[#allocation19_spill] sm:$0xff] }
 0x1ef   :  { %1755 = vst.msk [vmem:[%s3501_s4 + $0x90] sm:$0xff] %vm1736_vm0, %v1626_v35  ;;  %v2080_v17 = vpack.c.bf16 %v952_v60, %v951_v2  ;;  %2475 = vrsqrt.f32 %v762_v57  ;;  %v732_v18 = vmax.f32 %v3275_v32, 1e-24  ;;  %v731_v28 = vmax.f32 %v3277_v42, 1e-24 }
 0x1f0   :  { %1788 = vst.msk [vmem:[%s3501_s4 + $0x198] sm:$0xff] %vm1736_vm0, %v1659_v58  ;;  %v1658_v31 = vmul.f32 -2.0, %v1399_v21  ;;  %v1370_v29 = vmul.f32 %v1306_v30, %v3243_v44  ;;  %2477 = vrsqrt.f32 %v761_v16  ;;  %v696_v15 = vpop.xlane.xlu1 %695  ;;  %v764_v62 = vmax.f32 %v3297_v23, 1e-24  ;;  %v3569_v16 = vld [vmem:[#allocation20_spill] sm:$0xff] }
 0x1f1   :  { %v3342_v6 = vpop.xlane.xlu0 %693  ;;  %2136 = vst [vmem:[#allocation7 + $0xc8] sm:$0xff] %v2080_v17   ;;  %2479 = vrsqrt.f32 %v732_v18  ;;  %v763_v7 = vmax.f32 %v3299_v8, 1e-24  ;;  %v734_v11 = vmax.f32 %v3320_v49, 1e-24  ;;  %v858_v25 = vmul.f32 %v2472_v50, %v3565_v61 }
 0x1f2   :  { %1787 = vst.msk [vmem:[%s3501_s4 + $0x190] sm:$0xff] %vm1736_vm0, %v1658_v31  ;;  %v1629_v14 = vmul.f32 -2.0, %v1370_v29  ;;  %2481 = vrsqrt.f32 %v731_v28  ;;  %v733_v44 = vmax.f32 %v3322_v63, 1e-24  ;;  %v766_v22 = vmax.f32 %v696_v15, 1e-24 }
 0x1f3   :  { %2483 = vrsqrt.f32 %v764_v62  ;;  %v765_v12 = vmax.f32 %v3342_v6, 1e-24  ;;  %v1415_v51 = vshrl.u32 %v1414_v47, 7  ;;  %v922_v52 = vmul.f32 2.0, %v858_v25  ;;  %v3570_v28 = vld [vmem:[#allocation21_spill] sm:$0xff] }
 0x1f4   :  { %1758 = vst.msk [vmem:[%s3501_s4 + $0xa8] sm:$0xff] %vm1736_vm0, %v1629_v14  ;;  %2485 = vrsqrt.f32 %v763_v7  ;;  %v3357_v19 = vpop.xlane.xlu1 %635 }
 0x1f5   :  { %v3359_v37 = vpop.xlane.xlu0 %633  ;;  %2487 = vrsqrt.f32 %v734_v11  ;;  %v736_v3 = vmax.f32 %v3357_v19, 1e-24  ;;  %v3366_v40 = vadd.s32 448, %v1415_v51  ;;  %v3571_v11 = vld [vmem:[#allocation22_spill] sm:$0xff] }
 0x1f6   :  { %2489 = vrsqrt.f32 %v733_v44  ;;  %v735_v45 = vmax.f32 %v3359_v37, 1e-24 }
 0x1f7   :  { %2491 = vrsqrt.f32 %v766_v22  ;;  %vm1600_vm1 = vcmp.lt.s32.totalorder %v3366_v40, 450 }
 0x1f8   :  { %2493 = vrsqrt.f32 %v765_v12  ;;  %v700_v43 = vpop.xlane.xlu1 %699 }
 0x1f9   :  { %v698_v55 = vpop.xlane.xlu0 %697  ;;  %v2474_v26 = vpop.eup %2473  ;;  %2495 = vrsqrt.f32 %v736_v3  ;;  %v768_v59 = vmax.f32 %v700_v43, 1e-24 }
 0x1fa   :  { %v767_v13 = vmax.f32 %v698_v55, 1e-24  ;;  %v857_v36 = vmul.f32 %v2474_v26, %v3566_v4  ;;  %v1305_v5 = vmul.f32 %v2474_v26, %v2474_v26  ;;  %2497 = vrsqrt.f32 %v735_v45 }
 0x1fb   :  { %2499 = vrsqrt.f32 %v768_v59 }
 0x1fc   :  { %v2476_v1 = vpop.eup %2475  ;;  %v921_v56 = vmul.f32 2.0, %v857_v36  ;;  %v1369_v0 = vmul.f32 %v1305_v5, %v3245_v20  ;;  %2501 = vrsqrt.f32 %v767_v13  ;;  %v3368_v9 = vpop.xlane.xlu1 %639 }
 0x1fd   :  { %v3370_v53 = vpop.xlane.xlu0 %637  ;;  %v2478_v27 = vpop.eup %2477  ;;  %v890_v54 = vmul.f32 %v2476_v1, %v3567_v34  ;;  %v1338_v46 = vmul.f32 %v2476_v1, %v2476_v1  ;;  %v738_v60 = vmax.f32 %v3368_v9, 1e-24 }
 0x1fe   :  { %v737_v48 = vmax.f32 %v3370_v53, 1e-24  ;;  %v2480_v38 = vpop.eup %2479  ;;  %v2005_v24 = vpack.c.bf16 %v922_v52, %v921_v56  ;;  %v1628_v39 = vmul.f32 -2.0, %v1369_v0  ;;  %v889_v20 = vmul.f32 %v2478_v27, %v3568_v41  ;;  %v3573_v52 = vld [vmem:[#allocation24_spill] sm:$0xff]  ;;  %v3574_v0 = vld [vmem:[#allocation25_spill] sm:$0xff] }
 0x1ff   :  { %v1337_v50 = vmul.f32 %v2478_v27, %v2478_v27  ;;  %v2482_v35 = vpop.eup %2481  ;;  %v954_v2 = vmul.f32 2.0, %v890_v54  ;;  %v1402_v57 = vmul.f32 %v1338_v46, %v3261_v33  ;;  %v860_v58 = vmul.f32 %v2480_v38, %v3569_v16 }
 0x200   :  { %v1308_v21 = vmul.f32 %v2480_v38, %v2480_v38  ;;  %v2484_v30 = vpop.eup %2483  ;;  %2121 = vst [vmem:[#allocation7 + $0x50] sm:$0xff] %v2005_v24   ;;  %1757 = vst.msk [vmem:[%s3501_s4 + $0xa0] sm:$0xff] %vm1736_vm0, %v1628_v39  ;;  %v953_v17 = vmul.f32 2.0, %v889_v20  ;;  %v859_v31 = vmul.f32 %v2482_v35, %v3570_v28  ;;  %v1307_v29 = vmul.f32 %v2482_v35, %v2482_v35  ;;  %v3387_v61 = vpop.xlane.xlu1 %703  ;;  %v3575_v24 = vld [vmem:[#allocation26_spill] sm:$0xff] }
 0x201   :  { %v1401_v18 = vmul.f32 %v1337_v50, %v3263_v10  ;;  %v2486_v15 = vpop.eup %2485  ;;  %v1661_v62 = vmul.f32 -2.0, %v1402_v57  ;;  %v924_v7 = vmul.f32 2.0, %v860_v58  ;;  %v892_v14 = vmul.f32 %v2484_v30, %v3571_v11  ;;  %v3394_v55 = vpop.xlane.xlu0 %701 }
 0x202   :  { %v1372_v33 = vmul.f32 %v1308_v21, %v3275_v32  ;;  %v2488_v44 = vpop.eup %2487  ;;  %v2085_v22 = vpack.c.bf16 %v954_v2, %v953_v17  ;;  %v923_v12 = vmul.f32 2.0, %v859_v31  ;;  %v1371_v3 = vmul.f32 %v1307_v29, %v3277_v42  ;;  %v3572_v32 = vld [vmem:[#allocation23_spill] sm:$0xff]  ;;  %v3577_v31 = vld [vmem:[#allocation28_spill] sm:$0xff] }
 0x203   :  { %v1660_v47 = vmul.f32 -2.0, %v1401_v18  ;;  %v2490_v25 = vpop.eup %2489  ;;  %1790 = vst.msk [vmem:[%s3501_s4 + $0x1a8] sm:$0xff] %vm1736_vm0, %v1661_v62  ;;  %v956_v45 = vmul.f32 2.0, %v892_v14  ;;  %v1340_v51 = vmul.f32 %v2484_v30, %v2484_v30  ;;  %v891_v43 = vmul.f32 %v2486_v15, %v3572_v32  ;;  %v3576_v21 = vld [vmem:[#allocation27_spill] sm:$0xff] }
 0x204   :  { %v1631_v10 = vmul.f32 -2.0, %v1372_v33  ;;  %v2492_v26 = vpop.eup %2491  ;;  %2137 = vst [vmem:[#allocation7 + $0xd0] sm:$0xff] %v2085_v22   ;;  %v2010_v42 = vpack.c.bf16 %v924_v7, %v923_v12  ;;  %v1630_v59 = vmul.f32 -2.0, %v1371_v3  ;;  %v1339_v13 = vmul.f32 %v2486_v15, %v2486_v15  ;;  %v3417_v17 = vpop.xlane.xlu1 %643  ;;  %v3578_v33 = vld [vmem:[#allocation29_spill] sm:$0xff] }
 0x205   :  { %1789 = vst.msk [vmem:[%s3501_s4 + $0x1a0] sm:$0xff] %vm1736_vm0, %v1660_v47  ;;  %v862_v4 = vmul.f32 %v2488_v44, %v3573_v52  ;;  %v2494_v36 = vpop.eup %2493  ;;  %v1404_v5 = vmul.f32 %v1340_v51, %v3297_v23  ;;  %v955_v1 = vmul.f32 2.0, %v891_v43  ;;  %v1310_v56 = vmul.f32 %v2488_v44, %v2488_v44  ;;  %v3424_v15 = vpop.xlane.xlu0 %641  ;;  %v3579_v47 = vld [vmem:[#allocation30_spill] sm:$0xff] }
 0x206   :  { %1760 = vst.msk [vmem:[%s3501_s4 + $0xb8] sm:$0xff] %vm1736_vm0, %v1631_v10  ;;  %v861_v27 = vmul.f32 %v2490_v25, %v3574_v0  ;;  %v2496_v34 = vpop.eup %2495  ;;  %2122 = vst [vmem:[#allocation7 + $0x58] sm:$0xff] %v2010_v42   ;;  %v1403_v54 = vmul.f32 %v1339_v13, %v3299_v8  ;;  %v1309_v38 = vmul.f32 %v2490_v25, %v2490_v25  ;;  %2503 = vrsqrt.f32 %v738_v60 }
 0x207   :  { %1759 = vst.msk [vmem:[%s3501_s4 + $0xb0] sm:$0xff] %vm1736_vm0, %v1630_v59  ;;  %v926_v46 = vmul.f32 2.0, %v862_v4  ;;  %v894_v39 = vmul.f32 %v2492_v26, %v3575_v24  ;;  %v2498_v41 = vpop.eup %2497  ;;  %v1663_v20 = vmul.f32 -2.0, %v1404_v5  ;;  %v2090_v23 = vpack.c.bf16 %v956_v45, %v955_v1  ;;  %v3580_v45 = vld [vmem:[#allocation31_spill] sm:$0xff] }
 0x208   :  { %v1374_v50 = vmul.f32 %v1310_v56, %v3320_v49  ;;  %v925_v35 = vmul.f32 2.0, %v861_v27  ;;  %v2500_v2 = vpop.eup %2499  ;;  %v1662_v57 = vmul.f32 -2.0, %v1403_v54  ;;  %v1373_v16 = vmul.f32 %v1309_v38, %v3322_v63  ;;  %v708_v13 = vpop.xlane.xlu1 %707  ;;  %v3581_v56 = vld [vmem:[#allocation32_spill] sm:$0xff] }
 0x209   :  { %v958_v58 = vmul.f32 2.0, %v894_v39  ;;  %v893_v30 = vmul.f32 %v2494_v36, %v3576_v21  ;;  %v2502_v8 = vpop.eup %2501  ;;  %1792 = vst.msk [vmem:[%s3501_s4 + $0x1b8] sm:$0xff] %vm1736_vm0, %v1663_v20  ;;  %2138 = vst [vmem:[#allocation7 + $0xd8] sm:$0xff] %v2090_v23   ;;  %v1341_v49 = vmul.f32 %v2494_v36, %v2494_v36  ;;  %v864_v29 = vmul.f32 %v2496_v34, %v3577_v31  ;;  %v706_v36 = vpop.xlane.xlu0 %705  ;;  %v3584_v21 = vld [vmem:[#allocation35_spill] sm:$0xff] }
 0x20a   :  { %v1633_v18 = vmul.f32 -2.0, %v1374_v50  ;;  %v2015_v28 = vpack.c.bf16 %v926_v46, %v925_v35  ;;  %1791 = vst.msk [vmem:[%s3501_s4 + $0x1b0] sm:$0xff] %vm1736_vm0, %v1662_v57  ;;  %v1632_v63 = vmul.f32 -2.0, %v1373_v16  ;;  %v1312_v7 = vmul.f32 %v2496_v34, %v2496_v34  ;;  %v3582_v34 = vld [vmem:[#allocation33_spill] sm:$0xff]  ;;  %v3583_v35 = vld [vmem:[#allocation34_spill] sm:$0xff] }
 0x20b   :  { %v957_v62 = vmul.f32 2.0, %v893_v30  ;;  %v863_v11 = vmul.f32 %v2498_v41, %v3578_v33  ;;  %v1405_v14 = vmul.f32 %v1341_v49, %v3342_v6  ;;  %v928_v44 = vmul.f32 2.0, %v864_v29  ;;  %v3586_v29 = vld [vmem:[#allocation37_spill] sm:$0xff] }
 0x20c   :  { %1762 = vst.msk [vmem:[%s3501_s4 + $0xc8] sm:$0xff] %vm1736_vm0, %v1633_v18  ;;  %2123 = vst [vmem:[#allocation7 + $0x60] sm:$0xff] %v2015_v28   ;;  %v1311_v22 = vmul.f32 %v2498_v41, %v2498_v41  ;;  %v896_v12 = vmul.f32 %v2500_v2, %v3579_v47  ;;  %v1376_v25 = vmul.f32 %v1312_v7, %v3357_v19  ;;  %2505 = vrsqrt.f32 %v737_v48  ;;  %v3585_v18 = vld [vmem:[#allocation36_spill] sm:$0xff] }
 0x20d   :  { %1761 = vst.msk [vmem:[%s3501_s4 + $0xc0] sm:$0xff] %vm1736_vm0, %v1632_v63  ;;  %v2095_v3 = vpack.c.bf16 %v958_v58, %v957_v62  ;;  %v927_v10 = vmul.f32 2.0, %v863_v11  ;;  %v895_v51 = vmul.f32 %v2502_v8, %v3580_v45  ;;  %v1664_v32 = vmul.f32 -2.0, %v1405_v14  ;;  %v3587_v14 = vld [vmem:[#allocation38_spill] sm:$0xff] }
 0x20e   :  { %v1375_v43 = vmul.f32 %v1311_v22, %v3359_v37  ;;  %v960_v26 = vmul.f32 2.0, %v896_v12  ;;  %v1635_v6 = vmul.f32 -2.0, %v1376_v25  ;;  %v770_v4 = vmax.f32 %v3387_v61, 1e-24 }
 0x20f   :  { %2139 = vst [vmem:[#allocation7 + $0xe0] sm:$0xff] %v2095_v3   ;;  %v2020_v42 = vpack.c.bf16 %v928_v44, %v927_v10  ;;  %v959_v59 = vmul.f32 2.0, %v895_v51  ;;  %v1728_v19 = vsel %vm1600_vm1, %v1664_v32, -1e+30  ;;  %v769_v60 = vmax.f32 %v3394_v55, 1e-24 }
 0x210   :  { %v1634_v52 = vmul.f32 -2.0, %v1375_v43  ;;  %1793 = vst.msk [vmem:[%s3501_s4 + $0x1c0] sm:$0xff] %vm1736_vm0, %v1728_v19  ;;  %1764 = vst.msk [vmem:[%s3501_s4 + $0xd8] sm:$0xff] %vm1736_vm0, %v1635_v6  ;;  %v740_v40 = vmax.f32 %v3417_v17, 1e-24  ;;  %2507 = vrsqrt.f32 %v770_v4  ;;  %v3588_v3 = vld [vmem:[#allocation39_spill] sm:$0xff] }
 0x211   :  { %2124 = vst [vmem:[#allocation7 + $0x68] sm:$0xff] %v2020_v42   ;;  %v2100_v37 = vpack.c.bf16 %v960_v26, %v959_v59  ;;  %v739_v48 = vmax.f32 %v3424_v15, 1e-24  ;;  %v772_v61 = vmax.f32 %v708_v13, 1e-24  ;;  %2509 = vrsqrt.f32 %v769_v60 }
 0x212   :  { %1763 = vst.msk [vmem:[%s3501_s4 + $0xd0] sm:$0xff] %vm1736_vm0, %v1634_v52  ;;  %v771_v5 = vmax.f32 %v706_v36, 1e-24  ;;  %2511 = vrsqrt.f32 %v740_v40 }
 0x213   :  { %2140 = vst [vmem:[#allocation7 + $0xe8] sm:$0xff] %v2100_v37   ;;  %2513 = vrsqrt.f32 %v739_v48  ;;  %v2504_v1 = vpop.eup %2503 }
 0x214   :  { %2515 = vrsqrt.f32 %v772_v61  ;;  %v866_v0 = vmul.f32 %v2504_v1, %v3581_v56  ;;  %v1314_v27 = vmul.f32 %v2504_v1, %v2504_v1 }
 0x215   :  { %2517 = vrsqrt.f32 %v771_v5 }
 0x216   :  { %v930_v38 = vmul.f32 2.0, %v866_v0  ;;  %v1378_v24 = vmul.f32 %v1314_v27, %v3368_v9 }
 0x218   :  { %v1637_v50 = vmul.f32 -2.0, %v1378_v24 }
 0x219   :  { %v2506_v55 = vpop.eup %2505 }
 0x21a   :  { %v865_v54 = vmul.f32 %v2506_v55, %v3582_v34  ;;  %v1313_v46 = vmul.f32 %v2506_v55, %v2506_v55  ;;  %1766 = vst.msk [vmem:[%s3501_s4 + $0xe8] sm:$0xff] %vm1736_vm0, %v1637_v50 }
 0x21c   :  { %v929_v41 = vmul.f32 2.0, %v865_v54  ;;  %v1377_v20 = vmul.f32 %v1313_v46, %v3370_v53 }
 0x21d   :  { %v2508_v39 = vpop.eup %2507 }
 0x21e   :  { %v2510_v23 = vpop.eup %2509  ;;  %v898_v2 = vmul.f32 %v2508_v39, %v3583_v35  ;;  %v2025_v16 = vpack.c.bf16 %v930_v38, %v929_v41  ;;  %v1636_v58 = vmul.f32 -2.0, %v1377_v20 }
 0x21f   :  { %v2512_v57 = vpop.eup %2511  ;;  %v897_v30 = vmul.f32 %v2510_v23, %v3584_v21 }
 0x220   :  { %v2514_v8 = vpop.eup %2513  ;;  %v962_v9 = vmul.f32 2.0, %v898_v2  ;;  %v868_v28 = vmul.f32 %v2512_v57, %v3585_v18  ;;  %v1316_v49 = vmul.f32 %v2512_v57, %v2512_v57  ;;  %2125 = vst [vmem:[#allocation7 + $0x70] sm:$0xff] %v2025_v16   ;;  %1765 = vst.msk [vmem:[%s3501_s4 + $0xe0] sm:$0xff] %vm1736_vm0, %v1636_v58 }
 0x221   :  { %v2516_v53 = vpop.eup %2515  ;;  %v961_v31 = vmul.f32 2.0, %v897_v30  ;;  %v867_v63 = vmul.f32 %v2514_v8, %v3586_v29  ;;  %v1315_v62 = vmul.f32 %v2514_v8, %v2514_v8 }
 0x222   :  { %v2518_v7 = vpop.eup %2517  ;;  %v932_v33 = vmul.f32 2.0, %v868_v28  ;;  %v1380_v11 = vmul.f32 %v1316_v49, %v3417_v17  ;;  %v900_v44 = vmul.f32 %v2516_v53, %v3587_v14 }
 0x223   :  { %v2105_v22 = vpack.c.bf16 %v962_v9, %v961_v31  ;;  %v931_v47 = vmul.f32 2.0, %v867_v63  ;;  %v1379_v12 = vmul.f32 %v1315_v62, %v3424_v15  ;;  %v899_v25 = vmul.f32 %v2518_v7, %v3588_v3 }
 0x224   :  { %v1639_v10 = vmul.f32 -2.0, %v1380_v11  ;;  %v964_v45 = vmul.f32 2.0, %v900_v44 }
 0x225   :  { %2141 = vst [vmem:[#allocation7 + $0xf0] sm:$0xff] %v2105_v22   ;;  %v2030_v51 = vpack.c.bf16 %v932_v33, %v931_v47  ;;  %v1638_v32 = vmul.f32 -2.0, %v1379_v12  ;;  %v963_v43 = vmul.f32 2.0, %v899_v25 }
 0x226   :  { %1768 = vst.msk [vmem:[%s3501_s4 + $0xf8] sm:$0xff] %vm1736_vm0, %v1639_v10 }
 0x227   :  { %2126 = vst [vmem:[#allocation7 + $0x78] sm:$0xff] %v2030_v51   ;;  %1767 = vst.msk [vmem:[%s3501_s4 + $0xf0] sm:$0xff] %vm1736_vm0, %v1638_v32  ;;  %v2110_v17 = vpack.c.bf16 %v964_v45, %v963_v43 }
 0x229   :  { %2142 = vst [vmem:[#allocation7 + $0xf8] sm:$0xff] %v2110_v17  }
 0x22a   :  { %2570 = shalt.err (!%p2567_p0)
}
 0x22b   :  { %s2591_s15 = smov 64   ;;  %s2592_s16 = smov 4  }
 0x22c   :  { %1812 = dma.vmem_to_hbm [thread:$0]  %s1807_s10, 4096, %s3500_s3, [#allocation4], %s2591_s15, %s2591_s15, %s2592_s16  }
 0x22d   :  { %2583 = dma.done.wait [#allocation4], 4096  }
 0x22e   :  { %2584 = vsyncadd [#allocation4], 4294963200 }
 0x22f   :  { %1820 = vsyncpa [#allocation3], 1 }
 0x230   :  { %1821 = vsyncpa [#allocation6], 1 }
 0x231   :  { %1822 = vsyncpa [#allocation4], 1 }

</bundles_post_ra>
